<compile_context>
chip_gen: v6e
topology: v6e:2x2x1
jax: 0.10.0
libtpu: 0.0.40
codegen_flags: <defaults>
</compile_context>

<pallas_src>
import functools

import jax
import jax.numpy as jnp
from jax.experimental import pallas as pl
from jax.experimental.pallas import tpu as pltpu


# --------------------------- model constants -------------------------------

HEADS = 8          # x-transformers Attention default
DIM_HEAD = 64      # x-transformers DEFAULT_DIM_HEAD
HD_PAD = 128       # per-head width padded to one full lane group (zero-filled)
FF_MULT = 4        # FeedForward default
LN_EPS = 1e-5      # torch.nn.LayerNorm default eps
MM_DTYPE = jnp.bfloat16   # MXU operand dtype on v5e / v6e / v7x (f32 accumulation)

_SQRT1_2 = 0.7071067811865476


# --------------------------- in-kernel helpers ------------------------------

def _erf_f32(z):
    # Abramowitz & Stegun 7.1.26 rational approximation, max abs error ~1.5e-7 (~ f32 eps).
    t = 1.0 / (1.0 + 0.3275911 * jnp.abs(z))
    poly = ((((1.061405429 * t - 1.453152027) * t + 1.421413741) * t
             - 0.284496736) * t + 0.254829592) * t
    e = 1.0 - poly * jnp.exp(-z * z)
    return jnp.where(z < 0.0, -e, e)


def _gelu_exact(x, use_lax_erf):
    # exact (erf-based) GELU: 0.5 * x * (1 + erf(x / sqrt(2)))  == torch nn.GELU() default.
    # lax.erf (EUP transcendental slot) is preferred when it lowers; otherwise fall back
    # to a float32-accurate polynomial erf.
    z = x * _SQRT1_2
    erf_z = jax.lax.erf(z) if use_lax_erf else _erf_f32(z)
    return 0.5 * x * (1.0 + erf_z)


# --------------------------- fused whole-network kernel ----------------------

def _net_kernel(x_ref, mask_ref, wqkv_ref, wo_ref, w1_ref, w2_ref, vecs_ref, b1_ref,
                fln_ref, o_ref, *, heads, hd_pad, eps, use_lax_erf):
    layer = pl.program_id(0)
    last = pl.num_programs(0) - 1

    # Step 0: seed the resident residual stream. The output block has a constant index
    # map across the "arbitrary" depth axis, so it stays in VMEM for the whole network.
    @pl.when(layer == 0)
    def _():
        o_ref[...] = x_ref[...]

    x = o_ref[...]                                   # (M, D) f32 residual carry
    inner_p = heads * hd_pad

    wqkv = wqkv_ref[0]                               # (D, 3*inner_p)  bf16, scale folded in Wq
    wo = wo_ref[0]                                   # (inner_p, D)    bf16 (zero rows for pad)
    w1 = w1_ref[0]                                   # (D, F)          bf16
    w2 = w2_ref[0]                                   # (F, D)          bf16
    cdt = wqkv.dtype
    vecs = vecs_ref[0]                               # (8, D) f32 packed per-layer vectors
    ln1_g, ln1_b, bo = vecs[0:1], vecs[1:2], vecs[2:3]
    ln2_g, ln2_b, b2 = vecs[3:4], vecs[4:5], vecs[5:6]
    b1 = b1_ref[0]                                   # (1, F) f32

    def ln(v, g, b):
        mu = jnp.mean(v, axis=-1, keepdims=True)
        vc = v - mu
        var = jnp.mean(vc * vc, axis=-1, keepdims=True)      # biased variance (torch LayerNorm)
        return vc * jax.lax.rsqrt(var + eps) * g + b

    def mm(a, w):
        return jnp.dot(a.astype(cdt), w, preferred_element_type=jnp.float32)

    # ---------------- attention: x = x + Wo @ MHSA(LN1(x)) + bo ----------------
    xn = ln(x, ln1_g, ln1_b)
    qkv = mm(xn, wqkv).astype(cdt)                   # (M, 3*inner_p), fused QKV projection

    # Head-batched attention: stack per-head tiles (every slice is 128-lane aligned thanks
    # to the padded head dim) and run ONE batched dot_general for q.kT and one for p.v.
    q3 = jnp.stack([qkv[:, h * hd_pad:(h + 1) * hd_pad] for h in range(heads)], axis=0)
    k3 = jnp.stack([qkv[:, inner_p + h * hd_pad: inner_p + (h + 1) * hd_pad]
                    for h in range(heads)], axis=0)
    v3 = jnp.stack([qkv[:, 2 * inner_p + h * hd_pad: 2 * inner_p + (h + 1) * hd_pad]
                    for h in range(heads)], axis=0)  # each (heads, M, hd_pad)

    s = jax.lax.dot_general(q3, k3, (((2,), (2,)), ((0,), (0,))),
                            preferred_element_type=jnp.float32)     # (H, M, M)
    s = s + mask_ref[...]                            # block-diagonal batch mask (0 / -1e30)
    s = s - jnp.max(s, axis=-1, keepdims=True)
    p = jnp.exp(s)
    # NOTE: approximate reciprocal (~2^-12 rel. err vs exact torch softmax), EUP slot.
    inv_l = pl.reciprocal(jnp.sum(p, axis=-1, keepdims=True), approx=True)
    o3 = jax.lax.dot_general(p.astype(cdt), v3, (((2,), (1,)), ((0,), (0,))),
                             preferred_element_type=jnp.float32) * inv_l   # (H, M, hd_pad)

    attn = jnp.concatenate([o3[h] for h in range(heads)], axis=1)    # (M, inner_p)
    x = x + mm(attn, wo) + bo                        # ONE K=inner_p output projection

    # ---------------- feed-forward: x = x + W2 @ GELU(W1 @ LN2(x) + b1) + b2 ----------------
    xn2 = ln(x, ln2_g, ln2_b)
    h1 = _gelu_exact(mm(xn2, w1) + b1, use_lax_erf)
    x = x + mm(h1, w2) + b2

    @pl.when(layer != last)
    def _():
        o_ref[...] = x

    @pl.when(layer == last)                          # fused final LayerNorm
    def _():
        o_ref[...] = ln(x, fln_ref[0:1], fln_ref[1:2])


# ------------------------------ model glue -----------------------------------

def init_params(key, vocab_size, max_seq_len, dim, depth):
    """Torch-layout parameters (same structure as the PyTorch module)."""
    inner = HEADS * DIM_HEAD
    ff_inner = dim * FF_MULT
    keys = jax.random.split(key, 2 + 4 * depth)
    kit = iter(keys)

    def w(shape, scale=0.02):
        return (scale * jax.random.normal(next(kit), shape)).astype(jnp.float32)

    params = {
        "token_emb": w((vocab_size, dim)),
        "pos_emb": w((max_seq_len, dim)),
        "final_ln_g": jnp.ones((1, dim), jnp.float32),
        "final_ln_b": jnp.zeros((1, dim), jnp.float32),
        "layers": [],
    }
    for _ in range(depth):
        params["layers"].append({
            "ln1_g": jnp.ones((1, dim), jnp.float32),
            "ln1_b": jnp.zeros((1, dim), jnp.float32),
            "Wqkv": w((dim, 3 * inner)),     # fused to_q/to_k/to_v (all bias=False)
            "Wo": w((inner, dim)),
            "bo": jnp.zeros((1, dim), jnp.float32),
            "ln2_g": jnp.ones((1, dim), jnp.float32),
            "ln2_b": jnp.zeros((1, dim), jnp.float32),
            "W1": w((dim, ff_inner)), "b1": jnp.zeros((1, ff_inner), jnp.float32),
            "W2": w((ff_inner, dim)), "b2": jnp.zeros((1, dim), jnp.float32),
        })
    return params


def pack_params(params):
    """One-time host-side transform into kernel layout:
       depth-stacked weights, head dim zero-padded to 128, attention scale folded into Wq,
       matmul weights cast to bf16, small vectors packed into two arrays."""
    D = params["token_emb"].shape[1]
    inner = HEADS * DIM_HEAD
    scale = DIM_HEAD ** -0.5          # 0.125: exact in bf16/f32

    def pad_head_cols(w):             # (D, inner) -> (D, HEADS*HD_PAD), zero-filled pad
        w = w.reshape(D, HEADS, DIM_HEAD)
        w = jnp.pad(w, ((0, 0), (0, 0), (0, HD_PAD - DIM_HEAD)))
        return w.reshape(D, HEADS * HD_PAD)

    wqkv, wo, w1, w2, vecs, b1 = [], [], [], [], [], []
    for l in params["layers"]:
        q = pad_head_cols(l["Wqkv"][:, :inner] * scale)
        k = pad_head_cols(l["Wqkv"][:, inner:2 * inner])
        v = pad_head_cols(l["Wqkv"][:, 2 * inner:])
        wqkv.append(jnp.concatenate([q, k, v], axis=1))             # (D, 3*HEADS*HD_PAD)
        wop = l["Wo"].reshape(HEADS, DIM_HEAD, D)
        wop = jnp.pad(wop, ((0, 0), (0, HD_PAD - DIM_HEAD), (0, 0)))
        wo.append(wop.reshape(HEADS * HD_PAD, D))                   # zero rows for padding
        w1.append(l["W1"]); w2.append(l["W2"]); b1.append(l["b1"])
        vecs.append(jnp.concatenate(
            [l["ln1_g"], l["ln1_b"], l["bo"], l["ln2_g"], l["ln2_b"], l["b2"],
             jnp.zeros_like(l["bo"]), jnp.zeros_like(l["bo"])], axis=0))  # (8, D)

    return {
        "token_emb": params["token_emb"],
        "pos_emb": params["pos_emb"],
        "Wqkv": jnp.stack(wqkv).astype(MM_DTYPE),     # (depth, D, 3*HEADS*HD_PAD)
        "Wo": jnp.stack(wo).astype(MM_DTYPE),         # (depth, HEADS*HD_PAD, D)
        "W1": jnp.stack(w1).astype(MM_DTYPE),         # (depth, D, ff_inner)
        "W2": jnp.stack(w2).astype(MM_DTYPE),         # (depth, ff_inner, D)
        "vecs": jnp.stack(vecs),                      # (depth, 8, D) f32
        "b1": jnp.stack(b1),                          # (depth, 1, ff_inner) f32
        "fln": jnp.concatenate([params["final_ln_g"], params["final_ln_b"]], axis=0),  # (2, D)
    }


def transformer_embedder_forward(tokens, packed, *, use_lax_erf=False):
    B, S = tokens.shape
    D = packed["token_emb"].shape[1]
    M = B * S
    depth, _, ff_inner = packed["W1"].shape
    inner_p = HEADS * HD_PAD

    # token-embedding gather + absolute positional embedding: tiny one-off op, left to XLA.
    x = jnp.take(packed["token_emb"], tokens, axis=0) + packed["pos_emb"][:S][None, :, :]
    x = x.reshape(M, D).astype(jnp.float32)

    # Additive block-diagonal batch mask so attention over all B*S rows never mixes batches.
    bid = jnp.arange(M, dtype=jnp.int32) // S
    attn_bias = jnp.where(bid[:, None] == bid[None, :], 0.0, -1e30).astype(jnp.float32)

    kern = functools.partial(_net_kernel, heads=HEADS, hd_pad=HD_PAD,
                             eps=LN_EPS, use_lax_erf=use_lax_erf)
    stacked = lambda d: (d, 0, 0)     # per-layer weights: depth-indexed (double-buffered)
    resident = lambda d: (0, 0)       # constant index across depth (resident)

    out = pl.pallas_call(
        kern,
        out_shape=jax.ShapeDtypeStruct((M, D), jnp.float32),
        grid=(depth,),
        in_specs=[
            pl.BlockSpec((M, D), resident),                    # x (read at layer 0 only)
            pl.BlockSpec((M, M), resident),                    # additive batch mask
            pl.BlockSpec((1, D, 3 * inner_p), stacked),        # fused Wqkv (padded heads)
            pl.BlockSpec((1, inner_p, D), stacked),            # Wo (padded heads)
            pl.BlockSpec((1, D, ff_inner), stacked),           # W1
            pl.BlockSpec((1, ff_inner, D), stacked),           # W2
            pl.BlockSpec((1, 8, D), stacked),                  # packed LN gammas/betas/biases
            pl.BlockSpec((1, 1, ff_inner), stacked),           # b1
            pl.BlockSpec((2, D), resident),                    # final LN gamma/beta
        ],
        out_specs=pl.BlockSpec((M, D), resident),              # resident residual carry
        compiler_params=pltpu.CompilerParams(dimension_semantics=("arbitrary",)),
    )(x, attn_bias, packed["Wqkv"], packed["Wo"], packed["W1"], packed["W2"],
      packed["vecs"], packed["b1"], packed["fln"])

    return out.reshape(B, S, D)


# ------------------------------ runtime config --------------------------------

def _pallas_supports_lax_erf():
    """True if jax.lax.erf lowers inside a Pallas TPU kernel on this JAX/libtpu version."""
    def _k(x_ref, o_ref):
        o_ref[...] = jax.lax.erf(x_ref[...])
    try:
        fn = pl.pallas_call(_k, out_shape=jax.ShapeDtypeStruct((8, 128), jnp.float32))
        jax.jit(fn).lower(jnp.zeros((8, 128), jnp.float32)).compile()
        return True
    except Exception:   # any lowering/compile failure -> polynomial erf fallback
        return False


# ------------------------------- main ---------------------------------------

if __name__ == "__main__":
    B, S = 2, 8
    VOCAB = 97
    MAX_SEQ = 77
    N_EMBED = 64     # n_embed
    N_LAYER = 2      # n_layer

    key = jax.random.PRNGKey(0)
    pkey, tkey = jax.random.split(key)
    params = init_params(pkey, VOCAB, MAX_SEQ, N_EMBED, N_LAYER)
    packed = pack_params(params)
    tokens = jax.random.randint(tkey, (B, S), 0, VOCAB, dtype=jnp.int32)

    use_lax_erf = _pallas_supports_lax_erf()
    fwd = jax.jit(functools.partial(transformer_embedder_forward, use_lax_erf=use_lax_erf))
    z = jax.block_until_ready(fwd(tokens, packed))

    assert z.shape == (B, S, N_EMBED), z.shape
    assert z.dtype == jnp.float32
    assert bool(jnp.all(jnp.isfinite(z)))
    print("KERNEL_OK")
</pallas_src>

<mosaic_0001>
module attributes {stable_mosaic.version = 11 : i64} {
  func.func @_net_kernel(%arg0: i32, %arg1: memref<16x64xf32, #tpu.memory_space<vmem>>, %arg2: memref<16x16xf32, #tpu.memory_space<vmem>>, %arg3: memref<1x64x3072xbf16, #tpu.memory_space<vmem>>, %arg4: memref<1x1024x64xbf16, #tpu.memory_space<vmem>>, %arg5: memref<1x64x256xbf16, #tpu.memory_space<vmem>>, %arg6: memref<1x256x64xbf16, #tpu.memory_space<vmem>>, %arg7: memref<1x8x64xf32, #tpu.memory_space<vmem>>, %arg8: memref<1x1x256xf32, #tpu.memory_space<vmem>>, %arg9: memref<2x64xf32, #tpu.memory_space<vmem>>, %arg10: memref<16x64xf32, #tpu.memory_space<vmem>>) attributes {dimension_semantics = [#tpu.dimension_semantics<arbitrary>], iteration_bounds = array<i64: 2>, scalar_prefetch = 0 : i64, scratch_operands = 0 : i64, tpu.core_type = #tpu.core_type<tc>, window_params = [{pipeline_mode = #tpu.pipeline_mode<synchronous>, transform_indices = @transform_0, window_bounds = array<i64: 16, 64>}, {pipeline_mode = #tpu.pipeline_mode<synchronous>, transform_indices = @transform_1, window_bounds = array<i64: 16, 16>}, {transform_indices = @transform_2, window_bounds = array<i64: 1, 64, 3072>}, {transform_indices = @transform_3, window_bounds = array<i64: 1, 1024, 64>}, {transform_indices = @transform_4, window_bounds = array<i64: 1, 64, 256>}, {transform_indices = @transform_5, window_bounds = array<i64: 1, 256, 64>}, {transform_indices = @transform_6, window_bounds = array<i64: 1, 8, 64>}, {transform_indices = @transform_7, window_bounds = array<i64: 1, 1, 256>}, {pipeline_mode = #tpu.pipeline_mode<synchronous>, transform_indices = @transform_8, window_bounds = array<i64: 2, 64>}, {pipeline_mode = #tpu.pipeline_mode<synchronous>, transform_indices = @transform_9, window_bounds = array<i64: 16, 64>}]} {
    %c0_i32 = arith.constant 0 : i32
    %0 = arith.cmpi eq, %arg0, %c0_i32 : i32
    %1 = arith.extui %0 : i1 to i32
    %c0_i32_0 = arith.constant 0 : i32
    %2 = arith.cmpi ne, %1, %c0_i32_0 : i32
    scf.if %2 {
      %c0_57 = arith.constant 0 : index
      %c0_58 = arith.constant 0 : index
      %210 = vector.load %arg1[%c0_57, %c0_58] : memref<16x64xf32, #tpu.memory_space<vmem>>, vector<16x64xf32>
      %c0_59 = arith.constant 0 : index
      %c0_60 = arith.constant 0 : index
      %211 = vector.load %arg10[%c0_59, %c0_60] : memref<16x64xf32, #tpu.memory_space<vmem>>, vector<16x64xf32>
      tpu.vector_store %arg10[%c0_59, %c0_60], %210 {strides = array<i32>} : memref<16x64xf32, #tpu.memory_space<vmem>>, vector<16x64xf32>,
    } else {
    }
    %c0 = arith.constant 0 : index
    %c0_1 = arith.constant 0 : index
    %3 = vector.load %arg10[%c0, %c0_1] : memref<16x64xf32, #tpu.memory_space<vmem>>, vector<16x64xf32>
    %c0_2 = arith.constant 0 : index
    %c0_3 = arith.constant 0 : index
    %c0_4 = arith.constant 0 : index
    %4 = vector.load %arg3[%c0_2, %c0_3, %c0_4] : memref<1x64x3072xbf16, #tpu.memory_space<vmem>>, vector<1x64x3072xbf16>
    %5 = vector.shape_cast %4 : vector<1x64x3072xbf16> to vector<64x3072xbf16>
    %c0_5 = arith.constant 0 : index
    %c0_6 = arith.constant 0 : index
    %c0_7 = arith.constant 0 : index
    %6 = vector.load %arg4[%c0_5, %c0_6, %c0_7] : memref<1x1024x64xbf16, #tpu.memory_space<vmem>>, vector<1x1024x64xbf16>
    %7 = vector.shape_cast %6 : vector<1x1024x64xbf16> to vector<1024x64xbf16>
    %c0_8 = arith.constant 0 : index
    %c0_9 = arith.constant 0 : index
    %c0_10 = arith.constant 0 : index
    %8 = vector.load %arg5[%c0_8, %c0_9, %c0_10] : memref<1x64x256xbf16, #tpu.memory_space<vmem>>, vector<1x64x256xbf16>
    %9 = vector.shape_cast %8 : vector<1x64x256xbf16> to vector<64x256xbf16>
    %c0_11 = arith.constant 0 : index
    %c0_12 = arith.constant 0 : index
    %c0_13 = arith.constant 0 : index
    %10 = vector.load %arg6[%c0_11, %c0_12, %c0_13] : memref<1x256x64xbf16, #tpu.memory_space<vmem>>, vector<1x256x64xbf16>
    %11 = vector.shape_cast %10 : vector<1x256x64xbf16> to vector<256x64xbf16>
    %c0_14 = arith.constant 0 : index
    %c0_15 = arith.constant 0 : index
    %c0_16 = arith.constant 0 : index
    %12 = vector.load %arg7[%c0_14, %c0_15, %c0_16] : memref<1x8x64xf32, #tpu.memory_space<vmem>>, vector<1x8x64xf32>
    %13 = vector.shape_cast %12 : vector<1x8x64xf32> to vector<8x64xf32>
    %14 = vector.extract_strided_slice %13 {offsets = [0, 0], sizes = [1, 64], strides = [1, 1]} : vector<8x64xf32> to vector<1x64xf32>
    %15 = vector.extract_strided_slice %13 {offsets = [1, 0], sizes = [1, 64], strides = [1, 1]} : vector<8x64xf32> to vector<1x64xf32>
    %16 = vector.extract_strided_slice %13 {offsets = [2, 0], sizes = [1, 64], strides = [1, 1]} : vector<8x64xf32> to vector<1x64xf32>
    %17 = vector.extract_strided_slice %13 {offsets = [3, 0], sizes = [1, 64], strides = [1, 1]} : vector<8x64xf32> to vector<1x64xf32>
    %18 = vector.extract_strided_slice %13 {offsets = [4, 0], sizes = [1, 64], strides = [1, 1]} : vector<8x64xf32> to vector<1x64xf32>
    %19 = vector.extract_strided_slice %13 {offsets = [5, 0], sizes = [1, 64], strides = [1, 1]} : vector<8x64xf32> to vector<1x64xf32>
    %c0_17 = arith.constant 0 : index
    %c0_18 = arith.constant 0 : index
    %c0_19 = arith.constant 0 : index
    %20 = vector.load %arg8[%c0_17, %c0_18, %c0_19] : memref<1x1x256xf32, #tpu.memory_space<vmem>>, vector<1x1x256xf32>
    %21 = vector.shape_cast %20 : vector<1x1x256xf32> to vector<1x256xf32>
    %cst = arith.constant dense<0.000000e+00> : vector<16xf32>
    %22 = vector.multi_reduction <add>, %3, %cst [1] : vector<16x64xf32> to vector<16xf32>
    %23 = vector.shape_cast %22 : vector<16xf32> to vector<16x1xf32>
    %cst_20 = arith.constant 6.400000e+01 : f32
    %24 = vector.broadcast %cst_20 : f32 to vector<16x1xf32>
    %25 = arith.divf %23, %24 : vector<16x1xf32>
    %26 = vector.broadcast %25 : vector<16x1xf32> to vector<16x64xf32>
    %27 = arith.subf %3, %26 : vector<16x64xf32>
    %28 = arith.mulf %27, %27 : vector<16x64xf32>
    %cst_21 = arith.constant dense<0.000000e+00> : vector<16xf32>
    %29 = vector.multi_reduction <add>, %28, %cst_21 [1] : vector<16x64xf32> to vector<16xf32>
    %30 = vector.shape_cast %29 : vector<16xf32> to vector<16x1xf32>
    %cst_22 = arith.constant 6.400000e+01 : f32
    %31 = vector.broadcast %cst_22 : f32 to vector<16x1xf32>
    %32 = arith.divf %30, %31 : vector<16x1xf32>
    %cst_23 = arith.constant 9.99999974E-6 : f32
    %33 = vector.broadcast %cst_23 : f32 to vector<16x1xf32>
    %34 = arith.addf %32, %33 : vector<16x1xf32>
    %35 = math.rsqrt %34 : vector<16x1xf32>
    %36 = vector.broadcast %35 : vector<16x1xf32> to vector<16x64xf32>
    %37 = arith.mulf %27, %36 : vector<16x64xf32>
    %38 = vector.broadcast %14 : vector<1x64xf32> to vector<16x64xf32>
    %39 = arith.mulf %37, %38 : vector<16x64xf32>
    %40 = vector.broadcast %15 : vector<1x64xf32> to vector<16x64xf32>
    %41 = arith.addf %39, %40 : vector<16x64xf32>
    %42 = arith.truncf %41 : vector<16x64xf32> to vector<16x64xbf16>
    %cst_24 = arith.constant dense<0.000000e+00> : vector<16x3072xf32>
    %43 = tpu.matmul %42, %5, %cst_24 {dimension_numbers = #tpu.dot_dimension_numbers<[1], [0], [0], [1], [0, 0, 1, 1], [], []>} : vector<16x64xbf16>, vector<64x3072xbf16>, vector<16x3072xf32> -> vector<16x3072xf32>
    %44 = arith.truncf %43 : vector<16x3072xf32> to vector<16x3072xbf16>
    %45 = vector.extract_strided_slice %44 {offsets = [0, 0], sizes = [16, 128], strides = [1, 1]} : vector<16x3072xbf16> to vector<16x128xbf16>
    %46 = vector.extract_strided_slice %44 {offsets = [0, 128], sizes = [16, 128], strides = [1, 1]} : vector<16x3072xbf16> to vector<16x128xbf16>
    %47 = vector.extract_strided_slice %44 {offsets = [0, 256], sizes = [16, 128], strides = [1, 1]} : vector<16x3072xbf16> to vector<16x128xbf16>
    %48 = vector.extract_strided_slice %44 {offsets = [0, 384], sizes = [16, 128], strides = [1, 1]} : vector<16x3072xbf16> to vector<16x128xbf16>
    %49 = vector.extract_strided_slice %44 {offsets = [0, 512], sizes = [16, 128], strides = [1, 1]} : vector<16x3072xbf16> to vector<16x128xbf16>
    %50 = vector.extract_strided_slice %44 {offsets = [0, 640], sizes = [16, 128], strides = [1, 1]} : vector<16x3072xbf16> to vector<16x128xbf16>
    %51 = vector.extract_strided_slice %44 {offsets = [0, 768], sizes = [16, 128], strides = [1, 1]} : vector<16x3072xbf16> to vector<16x128xbf16>
    %52 = vector.extract_strided_slice %44 {offsets = [0, 896], sizes = [16, 128], strides = [1, 1]} : vector<16x3072xbf16> to vector<16x128xbf16>
    %53 = vector.shape_cast %45 : vector<16x128xbf16> to vector<1x16x128xbf16>
    %54 = vector.shape_cast %46 : vector<16x128xbf16> to vector<1x16x128xbf16>
    %55 = vector.shape_cast %47 : vector<16x128xbf16> to vector<1x16x128xbf16>
    %56 = vector.shape_cast %48 : vector<16x128xbf16> to vector<1x16x128xbf16>
    %57 = vector.shape_cast %49 : vector<16x128xbf16> to vector<1x16x128xbf16>
    %58 = vector.shape_cast %50 : vector<16x128xbf16> to vector<1x16x128xbf16>
    %59 = vector.shape_cast %51 : vector<16x128xbf16> to vector<1x16x128xbf16>
    %60 = vector.shape_cast %52 : vector<16x128xbf16> to vector<1x16x128xbf16>
    %61 = tpu.concatenate %53, %54, %55, %56, %57, %58, %59, %60 in 0 : vector<1x16x128xbf16>, vector<1x16x128xbf16>, vector<1x16x128xbf16>, vector<1x16x128xbf16>, vector<1x16x128xbf16>, vector<1x16x128xbf16>, vector<1x16x128xbf16>, vector<1x16x128xbf16> -> vector<8x16x128xbf16>
    %62 = vector.extract_strided_slice %44 {offsets = [0, 1024], sizes = [16, 128], strides = [1, 1]} : vector<16x3072xbf16> to vector<16x128xbf16>
    %63 = vector.extract_strided_slice %44 {offsets = [0, 1152], sizes = [16, 128], strides = [1, 1]} : vector<16x3072xbf16> to vector<16x128xbf16>
    %64 = vector.extract_strided_slice %44 {offsets = [0, 1280], sizes = [16, 128], strides = [1, 1]} : vector<16x3072xbf16> to vector<16x128xbf16>
    %65 = vector.extract_strided_slice %44 {offsets = [0, 1408], sizes = [16, 128], strides = [1, 1]} : vector<16x3072xbf16> to vector<16x128xbf16>
    %66 = vector.extract_strided_slice %44 {offsets = [0, 1536], sizes = [16, 128], strides = [1, 1]} : vector<16x3072xbf16> to vector<16x128xbf16>
    %67 = vector.extract_strided_slice %44 {offsets = [0, 1664], sizes = [16, 128], strides = [1, 1]} : vector<16x3072xbf16> to vector<16x128xbf16>
    %68 = vector.extract_strided_slice %44 {offsets = [0, 1792], sizes = [16, 128], strides = [1, 1]} : vector<16x3072xbf16> to vector<16x128xbf16>
    %69 = vector.extract_strided_slice %44 {offsets = [0, 1920], sizes = [16, 128], strides = [1, 1]} : vector<16x3072xbf16> to vector<16x128xbf16>
    %70 = vector.shape_cast %62 : vector<16x128xbf16> to vector<1x16x128xbf16>
    %71 = vector.shape_cast %63 : vector<16x128xbf16> to vector<1x16x128xbf16>
    %72 = vector.shape_cast %64 : vector<16x128xbf16> to vector<1x16x128xbf16>
    %73 = vector.shape_cast %65 : vector<16x128xbf16> to vector<1x16x128xbf16>
    %74 = vector.shape_cast %66 : vector<16x128xbf16> to vector<1x16x128xbf16>
    %75 = vector.shape_cast %67 : vector<16x128xbf16> to vector<1x16x128xbf16>
    %76 = vector.shape_cast %68 : vector<16x128xbf16> to vector<1x16x128xbf16>
    %77 = vector.shape_cast %69 : vector<16x128xbf16> to vector<1x16x128xbf16>
    %78 = tpu.concatenate %70, %71, %72, %73, %74, %75, %76, %77 in 0 : vector<1x16x128xbf16>, vector<1x16x128xbf16>, vector<1x16x128xbf16>, vector<1x16x128xbf16>, vector<1x16x128xbf16>, vector<1x16x128xbf16>, vector<1x16x128xbf16>, vector<1x16x128xbf16> -> vector<8x16x128xbf16>
    %79 = vector.extract_strided_slice %44 {offsets = [0, 2048], sizes = [16, 128], strides = [1, 1]} : vector<16x3072xbf16> to vector<16x128xbf16>
    %80 = vector.extract_strided_slice %44 {offsets = [0, 2176], sizes = [16, 128], strides = [1, 1]} : vector<16x3072xbf16> to vector<16x128xbf16>
    %81 = vector.extract_strided_slice %44 {offsets = [0, 2304], sizes = [16, 128], strides = [1, 1]} : vector<16x3072xbf16> to vector<16x128xbf16>
    %82 = vector.extract_strided_slice %44 {offsets = [0, 2432], sizes = [16, 128], strides = [1, 1]} : vector<16x3072xbf16> to vector<16x128xbf16>
    %83 = vector.extract_strided_slice %44 {offsets = [0, 2560], sizes = [16, 128], strides = [1, 1]} : vector<16x3072xbf16> to vector<16x128xbf16>
    %84 = vector.extract_strided_slice %44 {offsets = [0, 2688], sizes = [16, 128], strides = [1, 1]} : vector<16x3072xbf16> to vector<16x128xbf16>
    %85 = vector.extract_strided_slice %44 {offsets = [0, 2816], sizes = [16, 128], strides = [1, 1]} : vector<16x3072xbf16> to vector<16x128xbf16>
    %86 = vector.extract_strided_slice %44 {offsets = [0, 2944], sizes = [16, 128], strides = [1, 1]} : vector<16x3072xbf16> to vector<16x128xbf16>
    %87 = vector.shape_cast %79 : vector<16x128xbf16> to vector<1x16x128xbf16>
    %88 = vector.shape_cast %80 : vector<16x128xbf16> to vector<1x16x128xbf16>
    %89 = vector.shape_cast %81 : vector<16x128xbf16> to vector<1x16x128xbf16>
    %90 = vector.shape_cast %82 : vector<16x128xbf16> to vector<1x16x128xbf16>
    %91 = vector.shape_cast %83 : vector<16x128xbf16> to vector<1x16x128xbf16>
    %92 = vector.shape_cast %84 : vector<16x128xbf16> to vector<1x16x128xbf16>
    %93 = vector.shape_cast %85 : vector<16x128xbf16> to vector<1x16x128xbf16>
    %94 = vector.shape_cast %86 : vector<16x128xbf16> to vector<1x16x128xbf16>
    %95 = tpu.concatenate %87, %88, %89, %90, %91, %92, %93, %94 in 0 : vector<1x16x128xbf16>, vector<1x16x128xbf16>, vector<1x16x128xbf16>, vector<1x16x128xbf16>, vector<1x16x128xbf16>, vector<1x16x128xbf16>, vector<1x16x128xbf16>, vector<1x16x128xbf16> -> vector<8x16x128xbf16>
    %cst_25 = arith.constant dense<0.000000e+00> : vector<8x16x16xf32>
    %96 = tpu.matmul %61, %78, %cst_25 {dimension_numbers = #tpu.dot_dimension_numbers<[2], [2], [1], [1], [0, 0, 0, 1, 1, 1], [0], [0]>} : vector<8x16x128xbf16>, vector<8x16x128xbf16>, vector<8x16x16xf32> -> vector<8x16x16xf32>
    %c0_26 = arith.constant 0 : index
    %c0_27 = arith.constant 0 : index
    %97 = vector.load %arg2[%c0_26, %c0_27] : memref<16x16xf32, #tpu.memory_space<vmem>>, vector<16x16xf32>
    %98 = vector.shape_cast %97 : vector<16x16xf32> to vector<1x16x16xf32>
    %99 = vector.broadcast %98 : vector<1x16x16xf32> to vector<8x16x16xf32>
    %100 = arith.addf %96, %99 : vector<8x16x16xf32>
    %cst_28 = arith.constant dense<0xFF800000> : vector<8x16xf32>
    %101 = vector.multi_reduction <maximumf>, %100, %cst_28 [2] : vector<8x16x16xf32> to vector<8x16xf32>
    %102 = vector.shape_cast %101 : vector<8x16xf32> to vector<8x16x1xf32>
    %103 = vector.broadcast %102 : vector<8x16x1xf32> to vector<8x16x16xf32>
    %104 = arith.subf %100, %103 : vector<8x16x16xf32>
    %105 = math.exp %104 : vector<8x16x16xf32>
    %cst_29 = arith.constant dense<0.000000e+00> : vector<8x16xf32>
    %106 = vector.multi_reduction <add>, %105, %cst_29 [2] : vector<8x16x16xf32> to vector<8x16xf32>
    %107 = vector.shape_cast %106 : vector<8x16xf32> to vector<8x16x1xf32>
    %108 = tpu.reciprocal %107 {approx = true} : vector<8x16x1xf32> -> vector<8x16x1xf32>
    %109 = arith.truncf %105 : vector<8x16x16xf32> to vector<8x16x16xbf16>
    %cst_30 = arith.constant dense<0.000000e+00> : vector<8x16x128xf32>
    %110 = tpu.matmul %109, %95, %cst_30 {dimension_numbers = #tpu.dot_dimension_numbers<[2], [1], [1], [2], [0, 0, 0, 1, 1, 2], [0], [0]>} : vector<8x16x16xbf16>, vector<8x16x128xbf16>, vector<8x16x128xf32> -> vector<8x16x128xf32>
    %111 = vector.broadcast %108 : vector<8x16x1xf32> to vector<8x16x128xf32>
    %112 = arith.mulf %110, %111 : vector<8x16x128xf32>
    %113 = vector.extract_strided_slice %112 {offsets = [0, 0, 0], sizes = [1, 16, 128], strides = [1, 1, 1]} : vector<8x16x128xf32> to vector<1x16x128xf32>
    %114 = vector.shape_cast %113 : vector<1x16x128xf32> to vector<16x128xf32>
    %115 = vector.extract_strided_slice %112 {offsets = [1, 0, 0], sizes = [1, 16, 128], strides = [1, 1, 1]} : vector<8x16x128xf32> to vector<1x16x128xf32>
    %116 = vector.shape_cast %115 : vector<1x16x128xf32> to vector<16x128xf32>
    %117 = vector.extract_strided_slice %112 {offsets = [2, 0, 0], sizes = [1, 16, 128], strides = [1, 1, 1]} : vector<8x16x128xf32> to vector<1x16x128xf32>
    %118 = vector.shape_cast %117 : vector<1x16x128xf32> to vector<16x128xf32>
    %119 = vector.extract_strided_slice %112 {offsets = [3, 0, 0], sizes = [1, 16, 128], strides = [1, 1, 1]} : vector<8x16x128xf32> to vector<1x16x128xf32>
    %120 = vector.shape_cast %119 : vector<1x16x128xf32> to vector<16x128xf32>
    %121 = vector.extract_strided_slice %112 {offsets = [4, 0, 0], sizes = [1, 16, 128], strides = [1, 1, 1]} : vector<8x16x128xf32> to vector<1x16x128xf32>
    %122 = vector.shape_cast %121 : vector<1x16x128xf32> to vector<16x128xf32>
    %123 = vector.extract_strided_slice %112 {offsets = [5, 0, 0], sizes = [1, 16, 128], strides = [1, 1, 1]} : vector<8x16x128xf32> to vector<1x16x128xf32>
    %124 = vector.shape_cast %123 : vector<1x16x128xf32> to vector<16x128xf32>
    %125 = vector.extract_strided_slice %112 {offsets = [6, 0, 0], sizes = [1, 16, 128], strides = [1, 1, 1]} : vector<8x16x128xf32> to vector<1x16x128xf32>
    %126 = vector.shape_cast %125 : vector<1x16x128xf32> to vector<16x128xf32>
    %127 = vector.extract_strided_slice %112 {offsets = [7, 0, 0], sizes = [1, 16, 128], strides = [1, 1, 1]} : vector<8x16x128xf32> to vector<1x16x128xf32>
    %128 = vector.shape_cast %127 : vector<1x16x128xf32> to vector<16x128xf32>
    %129 = tpu.concatenate %114, %116, %118, %120, %122, %124, %126, %128 in 1 : vector<16x128xf32>, vector<16x128xf32>, vector<16x128xf32>, vector<16x128xf32>, vector<16x128xf32>, vector<16x128xf32>, vector<16x128xf32>, vector<16x128xf32> -> vector<16x1024xf32>
    %130 = arith.truncf %129 : vector<16x1024xf32> to vector<16x1024xbf16>
    %cst_31 = arith.constant dense<0.000000e+00> : vector<16x64xf32>
    %131 = tpu.matmul %130, %7, %cst_31 {dimension_numbers = #tpu.dot_dimension_numbers<[1], [0], [0], [1], [0, 0, 1, 1], [], []>} : vector<16x1024xbf16>, vector<1024x64xbf16>, vector<16x64xf32> -> vector<16x64xf32>
    %132 = arith.addf %3, %131 : vector<16x64xf32>
    %133 = vector.broadcast %16 : vector<1x64xf32> to vector<16x64xf32>
    %134 = arith.addf %132, %133 : vector<16x64xf32>
    %cst_32 = arith.constant dense<0.000000e+00> : vector<16xf32>
    %135 = vector.multi_reduction <add>, %134, %cst_32 [1] : vector<16x64xf32> to vector<16xf32>
    %136 = vector.shape_cast %135 : vector<16xf32> to vector<16x1xf32>
    %cst_33 = arith.constant 6.400000e+01 : f32
    %137 = vector.broadcast %cst_33 : f32 to vector<16x1xf32>
    %138 = arith.divf %136, %137 : vector<16x1xf32>
    %139 = vector.broadcast %138 : vector<16x1xf32> to vector<16x64xf32>
    %140 = arith.subf %134, %139 : vector<16x64xf32>
    %141 = arith.mulf %140, %140 : vector<16x64xf32>
    %cst_34 = arith.constant dense<0.000000e+00> : vector<16xf32>
    %142 = vector.multi_reduction <add>, %141, %cst_34 [1] : vector<16x64xf32> to vector<16xf32>
    %143 = vector.shape_cast %142 : vector<16xf32> to vector<16x1xf32>
    %cst_35 = arith.constant 6.400000e+01 : f32
    %144 = vector.broadcast %cst_35 : f32 to vector<16x1xf32>
    %145 = arith.divf %143, %144 : vector<16x1xf32>
    %cst_36 = arith.constant 9.99999974E-6 : f32
    %146 = vector.broadcast %cst_36 : f32 to vector<16x1xf32>
    %147 = arith.addf %145, %146 : vector<16x1xf32>
    %148 = math.rsqrt %147 : vector<16x1xf32>
    %149 = vector.broadcast %148 : vector<16x1xf32> to vector<16x64xf32>
    %150 = arith.mulf %140, %149 : vector<16x64xf32>
    %151 = vector.broadcast %17 : vector<1x64xf32> to vector<16x64xf32>
    %152 = arith.mulf %150, %151 : vector<16x64xf32>
    %153 = vector.broadcast %18 : vector<1x64xf32> to vector<16x64xf32>
    %154 = arith.addf %152, %153 : vector<16x64xf32>
    %155 = arith.truncf %154 : vector<16x64xf32> to vector<16x64xbf16>
    %cst_37 = arith.constant dense<0.000000e+00> : vector<16x256xf32>
    %156 = tpu.matmul %155, %9, %cst_37 {dimension_numbers = #tpu.dot_dimension_numbers<[1], [0], [0], [1], [0, 0, 1, 1], [], []>} : vector<16x64xbf16>, vector<64x256xbf16>, vector<16x256xf32> -> vector<16x256xf32>
    %157 = vector.broadcast %21 : vector<1x256xf32> to vector<16x256xf32>
    %158 = arith.addf %156, %157 : vector<16x256xf32>
    %cst_38 = arith.constant 0.707106769 : f32
    %159 = vector.broadcast %cst_38 : f32 to vector<16x256xf32>
    %160 = arith.mulf %158, %159 : vector<16x256xf32>
    %161 = math.absf %160 : vector<16x256xf32>
    %cst_39 = arith.constant 0.327591091 : f32
    %162 = vector.broadcast %cst_39 : f32 to vector<16x256xf32>
    %163 = arith.mulf %162, %161 : vector<16x256xf32>
    %cst_40 = arith.constant 1.000000e+00 : f32
    %164 = vector.broadcast %cst_40 : f32 to vector<16x256xf32>
    %165 = arith.addf %164, %163 : vector<16x256xf32>
    %cst_41 = arith.constant 1.000000e+00 : f32
    %166 = vector.broadcast %cst_41 : f32 to vector<16x256xf32>
    %167 = arith.divf %166, %165 : vector<16x256xf32>
    %cst_42 = arith.constant 1.06140542 : f32
    %168 = vector.broadcast %cst_42 : f32 to vector<16x256xf32>
    %169 = arith.mulf %168, %167 : vector<16x256xf32>
    %cst_43 = arith.constant 1.45315206 : f32
    %170 = vector.broadcast %cst_43 : f32 to vector<16x256xf32>
    %171 = arith.subf %169, %170 : vector<16x256xf32>
    %172 = arith.mulf %171, %167 : vector<16x256xf32>
    %cst_44 = arith.constant 1.42141378 : f32
    %173 = vector.broadcast %cst_44 : f32 to vector<16x256xf32>
    %174 = arith.addf %172, %173 : vector<16x256xf32>
    %175 = arith.mulf %174, %167 : vector<16x256xf32>
    %cst_45 = arith.constant 0.284496725 : f32
    %176 = vector.broadcast %cst_45 : f32 to vector<16x256xf32>
    %177 = arith.subf %175, %176 : vector<16x256xf32>
    %178 = arith.mulf %177, %167 : vector<16x256xf32>
    %cst_46 = arith.constant 0.254829586 : f32
    %179 = vector.broadcast %cst_46 : f32 to vector<16x256xf32>
    %180 = arith.addf %178, %179 : vector<16x256xf32>
    %181 = arith.mulf %180, %167 : vector<16x256xf32>
    %cst_47 = arith.constant 0.000000e+00 : f32
    %182 = vector.broadcast %cst_47 : f32 to vector<16x256xf32>
    %183 = arith.subf %182, %160 : vector<16x256xf32>
    %184 = arith.mulf %183, %160 : vector<16x256xf32>
    %185 = math.exp %184 : vector<16x256xf32>
    %186 = arith.mulf %181, %185 : vector<16x256xf32>
    %cst_48 = arith.constant 1.000000e+00 : f32
    %187 = vector.broadcast %cst_48 : f32 to vector<16x256xf32>
    %188 = arith.subf %187, %186 : vector<16x256xf32>
    %cst_49 = arith.constant 0.000000e+00 : f32
    %189 = vector.broadcast %cst_49 : f32 to vector<16x256xf32>
    %190 = arith.cmpf olt, %160, %189 : vector<16x256xf32>
    %cst_50 = arith.constant 0.000000e+00 : f32
    %191 = vector.broadcast %cst_50 : f32 to vector<16x256xf32>
    %192 = arith.subf %191, %188 : vector<16x256xf32>
    %193 = arith.select %190, %192, %188 : vector<16x256xi1>, vector<16x256xf32>
    %cst_51 = arith.constant 5.000000e-01 : f32
    %194 = vector.broadcast %cst_51 : f32 to vector<16x256xf32>
    %195 = arith.mulf %194, %158 : vector<16x256xf32>
    %cst_52 = arith.constant 1.000000e+00 : f32
    %196 = vector.broadcast %cst_52 : f32 to vector<16x256xf32>
    %197 = arith.addf %196, %193 : vector<16x256xf32>
    %198 = arith.mulf %195, %197 : vector<16x256xf32>
    %199 = arith.truncf %198 : vector<16x256xf32> to vector<16x256xbf16>
    %cst_53 = arith.constant dense<0.000000e+00> : vector<16x64xf32>
    %200 = tpu.matmul %199, %11, %cst_53 {dimension_numbers = #tpu.dot_dimension_numbers<[1], [0], [0], [1], [0, 0, 1, 1], [], []>} : vector<16x256xbf16>, vector<256x64xbf16>, vector<16x64xf32> -> vector<16x64xf32>
    %201 = arith.addf %134, %200 : vector<16x64xf32>
    %202 = vector.broadcast %19 : vector<1x64xf32> to vector<16x64xf32>
    %203 = arith.addf %201, %202 : vector<16x64xf32>
    %c1_i32 = arith.constant 1 : i32
    %204 = arith.cmpi ne, %arg0, %c1_i32 : i32
    %205 = arith.extui %204 : i1 to i32
    %c0_i32_54 = arith.constant 0 : i32
    %206 = arith.cmpi ne, %205, %c0_i32_54 : i32
    scf.if %206 {
      %c0_57 = arith.constant 0 : index
      %c0_58 = arith.constant 0 : index
      %210 = vector.load %arg10[%c0_57, %c0_58] : memref<16x64xf32, #tpu.memory_space<vmem>>, vector<16x64xf32>
      tpu.vector_store %arg10[%c0_57, %c0_58], %203 {strides = array<i32>} : memref<16x64xf32, #tpu.memory_space<vmem>>, vector<16x64xf32>,
    } else {
    }
    %c1_i32_55 = arith.constant 1 : i32
    %207 = arith.cmpi eq, %arg0, %c1_i32_55 : i32
    %208 = arith.extui %207 : i1 to i32
    %c0_i32_56 = arith.constant 0 : i32
    %209 = arith.cmpi ne, %208, %c0_i32_56 : i32
    scf.if %209 {
      %c0_57 = arith.constant 0 : index
      %c0_58 = arith.constant 0 : index
      %210 = vector.load %arg9[%c0_57, %c0_58] : memref<2x64xf32, #tpu.memory_space<vmem>>, vector<1x64xf32>
      %c1 = arith.constant 1 : index
      %c0_59 = arith.constant 0 : index
      %211 = vector.load %arg9[%c1, %c0_59] : memref<2x64xf32, #tpu.memory_space<vmem>>, vector<1x64xf32>
      %cst_60 = arith.constant dense<0.000000e+00> : vector<16xf32>
      %212 = vector.multi_reduction <add>, %203, %cst_60 [1] : vector<16x64xf32> to vector<16xf32>
      %213 = vector.shape_cast %212 : vector<16xf32> to vector<16x1xf32>
      %cst_61 = arith.constant 6.400000e+01 : f32
      %214 = vector.broadcast %cst_61 : f32 to vector<16x1xf32>
      %215 = arith.divf %213, %214 : vector<16x1xf32>
      %216 = vector.broadcast %215 : vector<16x1xf32> to vector<16x64xf32>
      %217 = arith.subf %203, %216 : vector<16x64xf32>
      %218 = arith.mulf %217, %217 : vector<16x64xf32>
      %cst_62 = arith.constant dense<0.000000e+00> : vector<16xf32>
      %219 = vector.multi_reduction <add>, %218, %cst_62 [1] : vector<16x64xf32> to vector<16xf32>
      %220 = vector.shape_cast %219 : vector<16xf32> to vector<16x1xf32>
      %cst_63 = arith.constant 6.400000e+01 : f32
      %221 = vector.broadcast %cst_63 : f32 to vector<16x1xf32>
      %222 = arith.divf %220, %221 : vector<16x1xf32>
      %cst_64 = arith.constant 9.99999974E-6 : f32
      %223 = vector.broadcast %cst_64 : f32 to vector<16x1xf32>
      %224 = arith.addf %222, %223 : vector<16x1xf32>
      %225 = math.rsqrt %224 : vector<16x1xf32>
      %226 = vector.broadcast %225 : vector<16x1xf32> to vector<16x64xf32>
      %227 = arith.mulf %217, %226 : vector<16x64xf32>
      %228 = vector.broadcast %210 : vector<1x64xf32> to vector<16x64xf32>
      %229 = arith.mulf %227, %228 : vector<16x64xf32>
      %230 = vector.broadcast %211 : vector<1x64xf32> to vector<16x64xf32>
      %231 = arith.addf %229, %230 : vector<16x64xf32>
      %c0_65 = arith.constant 0 : index
      %c0_66 = arith.constant 0 : index
      %232 = vector.load %arg10[%c0_65, %c0_66] : memref<16x64xf32, #tpu.memory_space<vmem>>, vector<16x64xf32>
      tpu.vector_store %arg10[%c0_65, %c0_66], %231 {strides = array<i32>} : memref<16x64xf32, #tpu.memory_space<vmem>>, vector<16x64xf32>,
    } else {
    }
    return
  }
  func.func @transform_0(%arg0: i32) -> (i32, i32) {
    %c0_i32 = arith.constant 0 : i32
    %c0_i32_0 = arith.constant 0 : i32
    %c0_i32_1 = arith.constant 0 : i32
    return %c0_i32, %c0_i32_0 : i32, i32
  }
  func.func @transform_1(%arg0: i32) -> (i32, i32) {
    %c0_i32 = arith.constant 0 : i32
    %c0_i32_0 = arith.constant 0 : i32
    %c0_i32_1 = arith.constant 0 : i32
    return %c0_i32, %c0_i32_0 : i32, i32
  }
  func.func @transform_2(%arg0: i32) -> (i32, i32, i32) {
    %c0_i32 = arith.constant 0 : i32
    %c0_i32_0 = arith.constant 0 : i32
    %c0_i32_1 = arith.constant 0 : i32
    return %arg0, %c0_i32, %c0_i32_0 : i32, i32, i32
  }
  func.func @transform_3(%arg0: i32) -> (i32, i32, i32) {
    %c0_i32 = arith.constant 0 : i32
    %c0_i32_0 = arith.constant 0 : i32
    %c0_i32_1 = arith.constant 0 : i32
    return %arg0, %c0_i32, %c0_i32_0 : i32, i32, i32
  }
  func.func @transform_4(%arg0: i32) -> (i32, i32, i32) {
    %c0_i32 = arith.constant 0 : i32
    %c0_i32_0 = arith.constant 0 : i32
    %c0_i32_1 = arith.constant 0 : i32
    return %arg0, %c0_i32, %c0_i32_0 : i32, i32, i32
  }
  func.func @transform_5(%arg0: i32) -> (i32, i32, i32) {
    %c0_i32 = arith.constant 0 : i32
    %c0_i32_0 = arith.constant 0 : i32
    %c0_i32_1 = arith.constant 0 : i32
    return %arg0, %c0_i32, %c0_i32_0 : i32, i32, i32
  }
  func.func @transform_6(%arg0: i32) -> (i32, i32, i32) {
    %c0_i32 = arith.constant 0 : i32
    %c0_i32_0 = arith.constant 0 : i32
    %c0_i32_1 = arith.constant 0 : i32
    return %arg0, %c0_i32, %c0_i32_0 : i32, i32, i32
  }
  func.func @transform_7(%arg0: i32) -> (i32, i32, i32) {
    %c0_i32 = arith.constant 0 : i32
    %c0_i32_0 = arith.constant 0 : i32
    %c0_i32_1 = arith.constant 0 : i32
    return %arg0, %c0_i32, %c0_i32_0 : i32, i32, i32
  }
  func.func @transform_8(%arg0: i32) -> (i32, i32) {
    %c0_i32 = arith.constant 0 : i32
    %c0_i32_0 = arith.constant 0 : i32
    %c0_i32_1 = arith.constant 0 : i32
    return %c0_i32, %c0_i32_0 : i32, i32
  }
  func.func @transform_9(%arg0: i32) -> (i32, i32) {
    %c0_i32 = arith.constant 0 : i32
    %c0_i32_0 = arith.constant 0 : i32
    %c0_i32_1 = arith.constant 0 : i32
    return %c0_i32, %c0_i32_0 : i32, i32
  }
}

</mosaic_0001>

<bundles_post_ra>
// kernel: transformer_embedder_forward.1
= control target key start
LH: loop header
LB: loop body
LE: loop exit
PB: predicated region body
PF: predicated region fallthrough
CT: control target
= control target key end

     0   :  { %14 = vsyncpa [#allocation3], 0  ;;  %s4513_s30 = smov 0   ;;  %s5144_s0 = inlined_call_operand.vmem [shape: f32[16,64], index: 0, kind: input, shape index: {}]   ;;  %s5145_s1 = inlined_call_operand.vmem [shape: f32[16,16], index: 1, kind: input, shape index: {}]   ;;  %s5146_s2 = inlined_call_operand.vmem [shape: bf16[2,64,3072], index: 2, kind: input, shape index: {}]   ;;  %s5147_s3 = inlined_call_operand.vmem [shape: bf16[2,1024,64], index: 3, kind: input, shape index: {}]   ;;  %s5148_s4 = inlined_call_operand.vmem [shape: bf16[2,64,256], index: 4, kind: input, shape index: {}]   ;;  %s5149_s5 = inlined_call_operand.vmem [shape: bf16[2,256,64], index: 5, kind: input, shape index: {}]   ;;  %s5150_s6 = inlined_call_operand.vmem [shape: f32[2,8,64], index: 6, kind: input, shape index: {}]   ;;  %s5151_s7 = inlined_call_operand.vmem [shape: f32[2,1,256], index: 7, kind: input, shape index: {}]   ;;  %s5152_s8 = inlined_call_operand.vmem [shape: f32[2,64], index: 8, kind: input, shape index: {}]   ;;  %s5153_s9 = inlined_call_operand.hbm [shape: f32[16,64], index: 9, kind: output, shape index: {}]  }
   0x1 LB: > { %s4519_s10 = sadd.s32 4294967295, %s4455_s30   ;;  %p3740_p0 = scmp.ge.s32.totalorder %s4455_s30, 1  ;;  %s4455_s30 = sphi %s4513_s30, %s20_s30  }
   0x2   : > { %p331_p1 = scmp.lt.s32.totalorder %s4455_s30, 3 }
   0x4   : > { %p332_p2 = pnand %p3740_p0, %p331_p1 }
   0x5   : > { %p385_p3 = scmp.lt.s32.totalorder (!%p332_p2), %s4519_s10, 1  ;;  %p3750_p4 = scmp.ne.s32.totalorder (!%p332_p2), %s4519_s10, 0 }
   0x6   : > { %335 = sbr.rel (%p332_p2) target bundleno = 2511 (0x9cf), region = 56 }
   0xb   : > { %s386_s11 = scalar_select %p385_p3, %s4519_s10, 1 }
   0xd   : > { %s4213_s12 = smul.u32 768, %s386_s11  ;;  %s3972_s13 = sshll.u32 %s386_s11, 9 }
   0xe   : > { %s4528_s16 = scalar_lea.vmem %s5147_s3, %s3972_s13  ;;  %s3973_s17 = sshll.u32 %s386_s11, 6 }
   0xf   : > { %s4533_s20 = scalar_lea.vmem %s5146_s2, %s4213_s12  ;;  %s4538_s23 = scalar_lea.vmem %s5148_s4, %s3973_s17 }
  0x10   : > { %s3974_s24 = sshll.u32 %s386_s11, 7  ;;  %s3748_s25 = sshll.u32 %s386_s11, 3 }
  0x11   : > { %s4543_s28 = scalar_lea.vmem %s5149_s5, %s3974_s24  ;;  %s4548_s14 = scalar_lea.vmem %s5150_s6, %s3748_s25 }
  0x12   : > { %s3749_s15 = sshll.u32 %s386_s11, 1  ;;  %417 = sbr.rel (%p3750_p4) target bundleno = 25 (0x19), region = 60 }
  0x13   : > { %s4553_s19 = scalar_lea.vmem %s5151_s7, %s3749_s15 }
  0x17   : > { %v418_v0 = vld [vmem:[%s5144_s0] sm:$0xff]  ;;  %vm420_vm0 = vcmask 523264   ;;  %v419_v1 = vld [vmem:[%s5144_s0 + $0x8] sm:$0xff] }
  0x18   : > { %421 = vst.msk [vmem:[#allocation2] sm:$0xff] %vm420_vm0, %v418_v0  ;;  %422 = vst.msk [vmem:[#allocation2 + $0x8] sm:$0xff] %vm420_vm0, %v419_v1 }
  0x19 PF: > { %vm691_vm1 = vcmask 523264   ;;  %v497_v16 = vld [vmem:[%s4533_s20 + $0x240] sm:$0xff]  ;;  %v498_v18 = vld [vmem:[%s4533_s20 + $0x248] sm:$0xff]  ;;  %v499_v48 = vld [vmem:[%s4533_s20 + $0x250] sm:$0xff]  ;;  %v4457_v56 = vmov 0   ;;  %v719_v62 = vlaneseq  ;;  %vm4459_vm2 = vmmov 0  }
  0x1a   : > { %v509_v17 = vld [vmem:[%s4533_s20 + $0x2a0] sm:$0xff]  ;;  %v510_v20 = vld [vmem:[%s4533_s20 + $0x2a8] sm:$0xff]  ;;  %v511_v49 = vld [vmem:[%s4533_s20 + $0x2b0] sm:$0xff]  ;;  %1247 = vmatprep.mubr.bf16.mxu0 %v4457_v56  ;;  %1290 = vmatprep.mubr.bf16.mxu1 %v4457_v56  ;;  %vm2085_vm3 = vcmask 130048   ;;  %p3964_p5 = scmp.eq.s32.totalorder %s4519_s10, 1 }
  0x1b   : > { %v3824_v19 = vcombine.high %v497_v16, %v509_v17  ;;  %v3826_v21 = vcombine.high %v498_v18, %v510_v20  ;;  %v3823_v22 = vcombine.low %v497_v16, %v509_v17  ;;  %v3825_v23 = vcombine.low %v498_v18, %v510_v20  ;;  %v473_v24 = vld [vmem:[%s4533_s20 + $0x180] sm:$0xff]  ;;  %v474_v26 = vld [vmem:[%s4533_s20 + $0x188] sm:$0xff]  ;;  %v500_v50 = vld [vmem:[%s4533_s20 + $0x258] sm:$0xff] }
  0x1c   : > { %v485_v25 = vld [vmem:[%s4533_s20 + $0x1e0] sm:$0xff]  ;;  %v486_v28 = vld [vmem:[%s4533_s20 + $0x1e8] sm:$0xff]  ;;  %v3828_v51 = vcombine.high %v499_v48, %v511_v49  ;;  %v512_v52 = vld [vmem:[%s4533_s20 + $0x2b8] sm:$0xff]  ;;  %v3827_v53 = vcombine.low %v499_v48, %v511_v49  ;;  %v4596_v0 = vshrl.u32 %v719_v62, 7 }
  0x1d   : > { %1223 = vmatprep.subr.bf16.mxu0 %v3824_v19  ;;  %1266 = vmatprep.subr.bf16.mxu1 %v3826_v21  ;;  %v3800_v27 = vcombine.high %v473_v24, %v485_v25  ;;  %v3802_v29 = vcombine.high %v474_v26, %v486_v28  ;;  %v3799_v30 = vcombine.low %v473_v24, %v485_v25  ;;  %v449_v32 = vld [vmem:[%s4533_s20 + $0xc0] sm:$0xff]  ;;  %v450_v34 = vld [vmem:[%s4533_s20 + $0xc8] sm:$0xff]  ;;  %v476_v16 = vld [vmem:[%s4533_s20 + $0x198] sm:$0xff] }
  0x1e   : > { %1224 = vmatpush1.bf16.msra.mxu0 %v3823_v22  ;;  %1267 = vmatpush1.bf16.msra.mxu1 %v3825_v23  ;;  %v3801_v31 = vcombine.low %v474_v26, %v486_v28  ;;  %v461_v33 = vld [vmem:[%s4533_s20 + $0x120] sm:$0xff]  ;;  %v462_v36 = vld [vmem:[%s4533_s20 + $0x128] sm:$0xff]  ;;  %v3829_v54 = vcombine.low %v500_v50, %v512_v52  ;;  %v3830_v55 = vcombine.high %v500_v50, %v512_v52  ;;  %v721_v1 = vsub.s32 0, %v4596_v0  ;;  %v488_v17 = vld [vmem:[%s4533_s20 + $0x1f8] sm:$0xff] }
  0x1f   : > { %v423_v2 = vld [vmem:[#allocation2] sm:$0xff]  ;;  %v424_v3 = vld [vmem:[#allocation2 + $0x8] sm:$0xff]  ;;  %1225 = vmatprep.subr.bf16.mxu0 %v3800_v27  ;;  %1268 = vmatprep.subr.bf16.mxu1 %v3802_v29  ;;  %v3776_v35 = vcombine.high %v449_v32, %v461_v33  ;;  %v3778_v37 = vcombine.high %v450_v34, %v462_v36  ;;  %v3775_v38 = vcombine.low %v449_v32, %v461_v33  ;;  %v451_v22 = vld [vmem:[%s4533_s20 + $0xd0] sm:$0xff] }
  0x20   : > { %v692_v4 = vsel %vm691_vm1, %v423_v2, 0.0  ;;  %v695_v5 = vsel %vm691_vm1, %v424_v3, 0.0  ;;  %v3777_v39 = vcombine.low %v450_v34, %v462_v36  ;;  %v425_v40 = vld [vmem:[%s4533_s20] sm:$0xff]  ;;  %v426_v42 = vld [vmem:[%s4533_s20 + $0x8] sm:$0xff]  ;;  %v3806_v21 = vcombine.high %v476_v16, %v488_v17  ;;  %v463_v23 = vld [vmem:[%s4533_s20 + $0x130] sm:$0xff] }
  0x21   : > { %693 = vadd.xlane.f32.xlu0 %v692_v4  ;;  %v437_v41 = vld [vmem:[%s4533_s20 + $0x60] sm:$0xff]  ;;  %v438_v44 = vld [vmem:[%s4533_s20 + $0x68] sm:$0xff]  ;;  %v452_v24 = vld [vmem:[%s4533_s20 + $0xd8] sm:$0xff]  ;;  %v3805_v26 = vcombine.low %v476_v16, %v488_v17  ;;  %v3780_v27 = vcombine.high %v451_v22, %v463_v23  ;;  %v3779_v33 = vcombine.low %v451_v22, %v463_v23 }
  0x22   : > { %1226 = vmatpush1.bf16.msra.mxu0 %v3799_v30  ;;  %1269 = vmatpush1.bf16.msra.mxu1 %v3801_v31  ;;  %v3752_v43 = vcombine.high %v425_v40, %v437_v41  ;;  %v3754_v45 = vcombine.high %v426_v42, %v438_v44  ;;  %v3751_v46 = vcombine.low %v425_v40, %v437_v41  ;;  %v464_v25 = vld [vmem:[%s4533_s20 + $0x138] sm:$0xff]  ;;  %v427_v29 = vld [vmem:[%s4533_s20 + $0x10] sm:$0xff]  ;;  %v514_v40 = vld [vmem:[%s4533_s20 + $0x2c8] sm:$0xff] }
  0x23   : > { %1227 = vmatprep.subr.bf16.mxu0 %v3776_v35  ;;  %1270 = vmatprep.subr.bf16.mxu1 %v3778_v37  ;;  %v3753_v47 = vcombine.low %v426_v42, %v438_v44  ;;  %v3782_v28 = vcombine.high %v452_v24, %v464_v25  ;;  %v439_v30 = vld [vmem:[%s4533_s20 + $0x70] sm:$0xff]  ;;  %v428_v31 = vld [vmem:[%s4533_s20 + $0x18] sm:$0xff]  ;;  %v3781_v34 = vcombine.low %v452_v24, %v464_v25  ;;  %v501_v37 = vld [vmem:[%s4533_s20 + $0x260] sm:$0xff] }
  0x24   : > { %v440_v32 = vld [vmem:[%s4533_s20 + $0x78] sm:$0xff]  ;;  %v3756_v35 = vcombine.high %v427_v29, %v439_v30  ;;  %v3755_v41 = vcombine.low %v427_v29, %v439_v30  ;;  %v490_v48 = vld [vmem:[%s4533_s20 + $0x208] sm:$0xff]  ;;  %v429_v62 = vld [vmem:[%s4533_s20 + $0x20] sm:$0xff] }
  0x25   : > { %696 = vadd.xlane.f32.xlu0 %v695_v5  ;;  %v727_v5 = vsub.s32 1, %v4596_v0  ;;  %v3758_v36 = vcombine.high %v428_v31, %v440_v32  ;;  %v3757_v42 = vcombine.low %v428_v31, %v440_v32  ;;  %v492_v22 = vld [vmem:[%s4533_s20 + $0x218] sm:$0xff] }
  0x26   : > { %1228 = vmatpush1.bf16.msra.mxu0 %v3775_v38  ;;  %1271 = vmatpush1.bf16.msra.mxu1 %v3777_v39  ;;  %v513_v38 = vld [vmem:[%s4533_s20 + $0x2c0] sm:$0xff]  ;;  %v502_v39 = vld [vmem:[%s4533_s20 + $0x268] sm:$0xff]  ;;  %v468_v29 = vld [vmem:[%s4533_s20 + $0x158] sm:$0xff] }
  0x27   : > { %1229 = vmatprep.subr.bf16.mxu0 %v3752_v43  ;;  %1272 = vmatprep.subr.bf16.mxu1 %v3754_v45  ;;  %v3832_v43 = vcombine.high %v501_v37, %v513_v38  ;;  %v3834_v44 = vcombine.high %v502_v39, %v514_v40  ;;  %v477_v45 = vld [vmem:[%s4533_s20 + $0x1a0] sm:$0xff]  ;;  %v3831_v49 = vcombine.low %v501_v37, %v513_v38  ;;  %v444_v37 = vld [vmem:[%s4533_s20 + $0x98] sm:$0xff] }
  0x28   : > { %v3833_v50 = vcombine.low %v502_v39, %v514_v40 }
  0x2a   : > { %1230 = vmatpush1.bf16.msra.mxu0 %v3751_v46  ;;  %1273 = vmatpush1.bf16.msra.mxu1 %v3753_v47  ;;  %v489_v46 = vld [vmem:[%s4533_s20 + $0x200] sm:$0xff]  ;;  %v478_v47 = vld [vmem:[%s4533_s20 + $0x1a8] sm:$0xff] }
  0x2b   : > { %1309 = vmatprep.subr.bf16.mxu0 %v3828_v51  ;;  %1352 = vmatprep.subr.bf16.mxu1 %v3830_v55  ;;  %v3808_v51 = vcombine.high %v477_v45, %v489_v46  ;;  %v3810_v52 = vcombine.high %v478_v47, %v490_v48  ;;  %v454_v55 = vld [vmem:[%s4533_s20 + $0xe8] sm:$0xff] }
  0xaa   : > { %v694_v6 = vpop.xlane.xlu0 %693 }
  0xab   : > { %v699_v7 = vmul.f32 0.015625, %v694_v6 }
  0xad   : > { %v4564_v8 = vsub.f32 %v423_v2, %v699_v7  ;;  %v689_v2 = vld [vmem:[%s4548_s14] sm:$0xff] }
  0xae   : > { %v697_v9 = vpop.xlane.xlu0 %696  ;;  %v722_v4 = vrot.slane %v689_v2, %v721_v1 }
  0xaf   : > { %v700_v10 = vmul.f32 0.015625, %v697_v9  ;;  %v703_v11 = vmul.f32 %v4564_v8, %v4564_v8  ;;  %v728_v9 = vrot.slane %v689_v2, %v727_v5  ;;  %v430_v2 = vld [vmem:[%s4533_s20 + $0x28] sm:$0xff] }
  0xb1   : > { %v4568_v12 = vsub.f32 %v424_v3, %v700_v10  ;;  %v705_v13 = vsel %vm691_vm1, %v703_v11, 0.0 }
  0xb2   : > { %706 = vadd.xlane.f32.xlu1 %v705_v13 }
  0xb3   : > { %v704_v14 = vmul.f32 %v4568_v12, %v4568_v12 }
  0xb5   : > { %v708_v15 = vsel %vm691_vm1, %v704_v14, 0.0  ;;  %v475_v14 = vld [vmem:[%s4533_s20 + $0x190] sm:$0xff] }
  0xb6   : > { %709 = vadd.xlane.f32.xlu1 %v708_v15  ;;  %v487_v15 = vld [vmem:[%s4533_s20 + $0x1f0] sm:$0xff] }
 0x13b   : > { %v707_v57 = vpop.xlane.xlu1 %706 }
 0x13c   : > { %v711_v58 = vmul.f32 0.015625, %v707_v57  ;;  %v466_v57 = vld [vmem:[%s4533_s20 + $0x148] sm:$0xff] }
 0x13e   : > { %v713_v59 = vadd.f32 1e-05, %v711_v58  ;;  %v3807_v58 = vcombine.low %v477_v45, %v489_v46  ;;  %v518_v45 = vld [vmem:[%s4533_s20 + $0x2e8] sm:$0xff] }
 0x13f   : > { %v710_v60 = vpop.xlane.xlu1 %709 }
 0x140   : > { %4326 = vrsqrt.f32 %v713_v59  ;;  %v712_v61 = vmul.f32 0.015625, %v710_v60  ;;  %v3809_v59 = vcombine.low %v478_v47, %v490_v48 }
 0x142   : > { %v714_v63 = vadd.f32 1e-05, %v712_v61  ;;  %v3786_v61 = vcombine.high %v454_v55, %v466_v57 }
 0x144   : > { %4328 = vrsqrt.f32 %v714_v63  ;;  %v441_v63 = vld [vmem:[%s4533_s20 + $0x80] sm:$0xff] }
 0x14d   : > { %v4327_v3 = vpop.eup %4326 }
 0x14e   : > { %v717_v6 = vmul.f32 %v4327_v3, %v4564_v8  ;;  %v3804_v8 = vcombine.high %v475_v14, %v487_v15  ;;  %v442_v3 = vld [vmem:[%s4533_s20 + $0x88] sm:$0xff] }
 0x14f   : > { %v3761_v16 = vcombine.low %v430_v2, %v442_v3 }
 0x150   : > { %v723_v10 = vmul.f32 %v722_v4, %v717_v6  ;;  %v3785_v6 = vcombine.low %v454_v55, %v466_v57 }
 0x151   : > { %v4329_v7 = vpop.eup %4328 }
 0x152   : > { %v718_v11 = vmul.f32 %v4329_v7, %v4568_v12  ;;  %v729_v18 = vadd.f32 %v728_v9, %v723_v10  ;;  %v3803_v12 = vcombine.low %v475_v14, %v487_v15  ;;  %v3760_v7 = vcombine.high %v429_v62, %v441_v63  ;;  %v503_v10 = vld [vmem:[%s4533_s20 + $0x270] sm:$0xff]  ;;  %v516_v14 = vld [vmem:[%s4533_s20 + $0x2d8] sm:$0xff] }
 0x153   : > { %v3759_v15 = vcombine.low %v429_v62, %v441_v63  ;;  %v470_v62 = vld [vmem:[%s4533_s20 + $0x168] sm:$0xff] }
 0x154   : > { %v724_v13 = vmul.f32 %v722_v4, %v718_v11  ;;  %v515_v11 = vld [vmem:[%s4533_s20 + $0x2d0] sm:$0xff] }
 0x155   : > { %v3836_v17 = vcombine.high %v503_v10, %v515_v11  ;;  %v3835_v23 = vcombine.low %v503_v10, %v515_v11  ;;  %v446_v10 = vld [vmem:[%s4533_s20 + $0xa8] sm:$0xff] }
 0x156   : > { %v730_v19 = vadd.f32 %v728_v9, %v724_v13  ;;  %v3762_v9 = vcombine.high %v430_v2, %v442_v3  ;;  %v504_v13 = vld [vmem:[%s4533_s20 + $0x278] sm:$0xff] }
 0x157   : > { %v3837_v24 = vcombine.low %v504_v13, %v516_v14 }
 0x158   : > { %v4611_v20 = vpack.c.bf16 %v730_v19, %v729_v18  ;;  %v3838_v18 = vcombine.high %v504_v13, %v516_v14  ;;  %v479_v19 = vld [vmem:[%s4533_s20 + $0x1b0] sm:$0xff] }
 0x15a   : > { %3847 = vmatmul.mubr.msk.bf16.vlgmr.msra.gmra.mxu0 %vm691_vm1, %v4611_v20  ;;  %3848 = vmatmul.mubr.msk.bf16.vlgmr.msra.gmra.mxu1 %vm691_vm1, %v4611_v20 }
 0x15b   : > { %1310 = vmatpush1.bf16.msra.mxu0 %v3827_v53  ;;  %1353 = vmatpush1.bf16.msra.mxu1 %v3829_v54  ;;  %v453_v53 = vld [vmem:[%s4533_s20 + $0xe0] sm:$0xff] }
 0x15c   : > { %1311 = vmatprep.subr.bf16.mxu0 %v3804_v8  ;;  %1354 = vmatprep.subr.bf16.mxu1 %v3806_v21  ;;  %v465_v54 = vld [vmem:[%s4533_s20 + $0x140] sm:$0xff]  ;;  %v491_v8 = vld [vmem:[%s4533_s20 + $0x210] sm:$0xff]  ;;  %v480_v21 = vld [vmem:[%s4533_s20 + $0x1b8] sm:$0xff] }
 0x15d   : > { %1333 = vmatprep.mubr.bf16.mxu0 %v4457_v56  ;;  %1376 = vmatprep.mubr.bf16.mxu1 %v4457_v56  ;;  %v3784_v60 = vcombine.high %v453_v53, %v465_v54  ;;  %v3783_v4 = vcombine.low %v453_v53, %v465_v54  ;;  %v3812_v25 = vcombine.high %v479_v19, %v491_v8  ;;  %v494_v53 = vld [vmem:[%s4533_s20 + $0x228] sm:$0xff] }
 0x15e   : > { %v3811_v30 = vcombine.low %v479_v19, %v491_v8  ;;  %v3813_v31 = vcombine.low %v480_v21, %v492_v22  ;;  %v520_v19 = vld [vmem:[%s4533_s20 + $0x2f8] sm:$0xff] }
 0x15f   : > { %1312 = vmatpush1.bf16.msra.mxu0 %v3803_v12  ;;  %1355 = vmatpush1.bf16.msra.mxu1 %v3805_v26  ;;  %v3814_v12 = vcombine.high %v480_v21, %v492_v22  ;;  %v455_v26 = vld [vmem:[%s4533_s20 + $0xf0] sm:$0xff] }
 0x160   : > { %1313 = vmatprep.subr.bf16.mxu0 %v3780_v27  ;;  %1356 = vmatprep.subr.bf16.mxu1 %v3782_v28  ;;  %v467_v27 = vld [vmem:[%s4533_s20 + $0x150] sm:$0xff]  ;;  %v456_v28 = vld [vmem:[%s4533_s20 + $0xf8] sm:$0xff] }
 0x161   : > { %v3788_v32 = vcombine.high %v455_v26, %v467_v27  ;;  %v3787_v38 = vcombine.low %v455_v26, %v467_v27  ;;  %v3789_v39 = vcombine.low %v456_v28, %v468_v29  ;;  %v496_v26 = vld [vmem:[%s4533_s20 + $0x238] sm:$0xff] }
 0x163   : > { %1314 = vmatpush1.bf16.msra.mxu0 %v3779_v33  ;;  %1357 = vmatpush1.bf16.msra.mxu1 %v3781_v34  ;;  %v3790_v33 = vcombine.high %v456_v28, %v468_v29  ;;  %v431_v34 = vld [vmem:[%s4533_s20 + $0x30] sm:$0xff] }
 0x164   : > { %1315 = vmatprep.subr.bf16.mxu0 %v3756_v35  ;;  %1358 = vmatprep.subr.bf16.mxu1 %v3758_v36  ;;  %v443_v35 = vld [vmem:[%s4533_s20 + $0x90] sm:$0xff]  ;;  %v432_v36 = vld [vmem:[%s4533_s20 + $0x38] sm:$0xff] }
 0x165   : > { %v3764_v40 = vcombine.high %v431_v34, %v443_v35  ;;  %v3763_v46 = vcombine.low %v431_v34, %v443_v35  ;;  %v3765_v47 = vcombine.low %v432_v36, %v444_v37  ;;  %v472_v34 = vld [vmem:[%s4533_s20 + $0x178] sm:$0xff] }
 0x167   : > { %1316 = vmatpush1.bf16.msra.mxu0 %v3755_v41  ;;  %1359 = vmatpush1.bf16.msra.mxu1 %v3757_v42  ;;  %v3766_v41 = vcombine.high %v432_v36, %v444_v37  ;;  %v505_v42 = vld [vmem:[%s4533_s20 + $0x280] sm:$0xff] }
 0x168   : > { %1395 = vmatprep.subr.bf16.mxu0 %v3832_v43  ;;  %1438 = vmatprep.subr.bf16.mxu1 %v3834_v44  ;;  %v517_v43 = vld [vmem:[%s4533_s20 + $0x2e0] sm:$0xff]  ;;  %v506_v44 = vld [vmem:[%s4533_s20 + $0x288] sm:$0xff] }
 0x169   : > { %v3840_v48 = vcombine.high %v505_v42, %v517_v43  ;;  %v3839_v54 = vcombine.low %v505_v42, %v517_v43  ;;  %v3841_v55 = vcombine.low %v506_v44, %v518_v45  ;;  %v448_v42 = vld [vmem:[%s4533_s20 + $0xb8] sm:$0xff] }
 0x16a   : > { %3849 = vmatmul.mubr.msk.bf16.vlgmr.msra.gmra.mxu0 %vm691_vm1, %v4611_v20  ;;  %3850 = vmatmul.mubr.msk.bf16.vlgmr.msra.gmra.mxu1 %vm691_vm1, %v4611_v20 }
 0x16b   : > { %1396 = vmatpush1.bf16.msra.mxu0 %v3831_v49  ;;  %1439 = vmatpush1.bf16.msra.mxu1 %v3833_v50  ;;  %v3842_v49 = vcombine.high %v506_v44, %v518_v45  ;;  %v481_v50 = vld [vmem:[%s4533_s20 + $0x1c0] sm:$0xff] }
 0x16c   : > { %1397 = vmatprep.subr.bf16.mxu0 %v3808_v51  ;;  %1440 = vmatprep.subr.bf16.mxu1 %v3810_v52  ;;  %v493_v51 = vld [vmem:[%s4533_s20 + $0x220] sm:$0xff]  ;;  %v482_v52 = vld [vmem:[%s4533_s20 + $0x1c8] sm:$0xff] }
 0x16d   : > { %1419 = vmatprep.mubr.bf16.mxu0 %v4457_v56  ;;  %1462 = vmatprep.mubr.bf16.mxu1 %v4457_v56  ;;  %v3816_v57 = vcombine.high %v481_v50, %v493_v51  ;;  %v3815_v63 = vcombine.low %v481_v50, %v493_v51  ;;  %v3817_v2 = vcombine.low %v482_v52, %v494_v53 }
 0x16f   : > { %1398 = vmatpush1.bf16.msra.mxu0 %v3807_v58  ;;  %1441 = vmatpush1.bf16.msra.mxu1 %v3809_v59  ;;  %v3818_v58 = vcombine.high %v482_v52, %v494_v53  ;;  %v457_v59 = vld [vmem:[%s4533_s20 + $0x100] sm:$0xff] }
 0x170   : > { %1399 = vmatprep.subr.bf16.mxu0 %v3784_v60  ;;  %1442 = vmatprep.subr.bf16.mxu1 %v3786_v61  ;;  %v469_v60 = vld [vmem:[%s4533_s20 + $0x160] sm:$0xff]  ;;  %v458_v61 = vld [vmem:[%s4533_s20 + $0x108] sm:$0xff] }
 0x171   : > { %v3792_v3 = vcombine.high %v457_v59, %v469_v60  ;;  %v3791_v11 = vcombine.low %v457_v59, %v469_v60  ;;  %v3793_v13 = vcombine.low %v458_v61, %v470_v62 }
 0x173   : > { %1400 = vmatpush1.bf16.msra.mxu0 %v3783_v4  ;;  %1443 = vmatpush1.bf16.msra.mxu1 %v3785_v6  ;;  %v3794_v4 = vcombine.high %v458_v61, %v470_v62  ;;  %v433_v6 = vld [vmem:[%s4533_s20 + $0x40] sm:$0xff] }
 0x174   : > { %1401 = vmatprep.subr.bf16.mxu0 %v3760_v7  ;;  %1444 = vmatprep.subr.bf16.mxu1 %v3762_v9  ;;  %v445_v7 = vld [vmem:[%s4533_s20 + $0xa0] sm:$0xff]  ;;  %v434_v9 = vld [vmem:[%s4533_s20 + $0x48] sm:$0xff] }
 0x175   : > { %v3768_v14 = vcombine.high %v433_v6, %v445_v7  ;;  %v3767_v8 = vcombine.low %v433_v6, %v445_v7  ;;  %v3769_v21 = vcombine.low %v434_v9, %v446_v10 }
 0x177   : > { %1402 = vmatpush1.bf16.msra.mxu0 %v3759_v15  ;;  %1445 = vmatpush1.bf16.msra.mxu1 %v3761_v16  ;;  %v3770_v15 = vcombine.high %v434_v9, %v446_v10  ;;  %v507_v16 = vld [vmem:[%s4533_s20 + $0x290] sm:$0xff] }
 0x178   : > { %1481 = vmatprep.subr.bf16.mxu0 %v3836_v17  ;;  %1524 = vmatprep.subr.bf16.mxu1 %v3838_v18  ;;  %v519_v17 = vld [vmem:[%s4533_s20 + $0x2f0] sm:$0xff]  ;;  %v508_v18 = vld [vmem:[%s4533_s20 + $0x298] sm:$0xff] }
 0x179   : > { %v3844_v22 = vcombine.high %v507_v16, %v519_v17  ;;  %v3843_v27 = vcombine.low %v507_v16, %v519_v17  ;;  %v3845_v28 = vcombine.low %v508_v18, %v520_v19 }
 0x17a   : > { %3851 = vmatmul.mubr.msk.bf16.vlgmr.msra.gmra.mxu0 %vm691_vm1, %v4611_v20  ;;  %3852 = vmatmul.mubr.msk.bf16.vlgmr.msra.gmra.mxu1 %vm691_vm1, %v4611_v20 }
 0x17b   : > { %1482 = vmatpush1.bf16.msra.mxu0 %v3835_v23  ;;  %1525 = vmatpush1.bf16.msra.mxu1 %v3837_v24  ;;  %v3846_v23 = vcombine.high %v508_v18, %v520_v19  ;;  %v483_v24 = vld [vmem:[%s4533_s20 + $0x1d0] sm:$0xff] }
 0x17c   : > { %1483 = vmatprep.subr.bf16.mxu0 %v3812_v25  ;;  %1526 = vmatprep.subr.bf16.mxu1 %v3814_v12  ;;  %v495_v25 = vld [vmem:[%s4533_s20 + $0x230] sm:$0xff]  ;;  %v484_v12 = vld [vmem:[%s4533_s20 + $0x1d8] sm:$0xff] }
 0x17d   : > { %1505 = vmatprep.mubr.bf16.mxu0 %v4457_v56  ;;  %1548 = vmatprep.mubr.bf16.mxu1 %v4457_v56  ;;  %v3820_v29 = vcombine.high %v483_v24, %v495_v25  ;;  %v3819_v35 = vcombine.low %v483_v24, %v495_v25  ;;  %v3821_v36 = vcombine.low %v484_v12, %v496_v26 }
 0x17f   : > { %1484 = vmatpush1.bf16.msra.mxu0 %v3811_v30  ;;  %1527 = vmatpush1.bf16.msra.mxu1 %v3813_v31  ;;  %v3822_v30 = vcombine.high %v484_v12, %v496_v26  ;;  %v459_v31 = vld [vmem:[%s4533_s20 + $0x110] sm:$0xff] }
 0x180   : > { %1485 = vmatprep.subr.bf16.mxu0 %v3788_v32  ;;  %1528 = vmatprep.subr.bf16.mxu1 %v3790_v33  ;;  %v471_v32 = vld [vmem:[%s4533_s20 + $0x170] sm:$0xff]  ;;  %v460_v33 = vld [vmem:[%s4533_s20 + $0x118] sm:$0xff] }
 0x181   : > { %v3796_v37 = vcombine.high %v459_v31, %v471_v32  ;;  %v3795_v43 = vcombine.low %v459_v31, %v471_v32  ;;  %v3797_v44 = vcombine.low %v460_v33, %v472_v34 }
 0x183   : > { %1486 = vmatpush1.bf16.msra.mxu0 %v3787_v38  ;;  %1529 = vmatpush1.bf16.msra.mxu1 %v3789_v39  ;;  %v3798_v38 = vcombine.high %v460_v33, %v472_v34  ;;  %v435_v39 = vld [vmem:[%s4533_s20 + $0x50] sm:$0xff] }
 0x184   : > { %1487 = vmatprep.subr.bf16.mxu0 %v3764_v40  ;;  %1530 = vmatprep.subr.bf16.mxu1 %v3766_v41  ;;  %v447_v40 = vld [vmem:[%s4533_s20 + $0xb0] sm:$0xff]  ;;  %v436_v41 = vld [vmem:[%s4533_s20 + $0x58] sm:$0xff] }
 0x185   : > { %v3772_v45 = vcombine.high %v435_v39, %v447_v40 }
 0x187   : > { %1488 = vmatpush1.bf16.msra.mxu0 %v3763_v46  ;;  %1531 = vmatpush1.bf16.msra.mxu1 %v3765_v47  ;;  %v3774_v46 = vcombine.high %v436_v41, %v448_v42  ;;  %v3771_v47 = vcombine.low %v435_v39, %v447_v40 }
 0x188   : > { %1567 = vmatprep.subr.bf16.mxu0 %v3840_v48  ;;  %1610 = vmatprep.subr.bf16.mxu1 %v3842_v49  ;;  %v3773_v48 = vcombine.low %v436_v41, %v448_v42  ;;  %v4458_v49 = vmov 0.0  }
 0x18a   : > { %3853 = vmatmul.mubr.msk.bf16.vlgmr.msra.gmra.mxu0 %vm691_vm1, %v4611_v20  ;;  %3854 = vmatmul.mubr.msk.bf16.vlgmr.msra.gmra.mxu1 %vm691_vm1, %v4611_v20 }
 0x18b   : > { %1568 = vmatpush1.bf16.msra.mxu0 %v3839_v54  ;;  %1611 = vmatpush1.bf16.msra.mxu1 %v3841_v55 }
 0x18c   : > { %1569 = vmatprep.subr.bf16.mxu0 %v3816_v57  ;;  %1612 = vmatprep.subr.bf16.mxu1 %v3818_v58 }
 0x18d   : > { %1591 = vmatprep.mubr.bf16.mxu0 %v4457_v56  ;;  %1634 = vmatprep.mubr.bf16.mxu1 %v4457_v56 }
 0x18f   : > { %1570 = vmatpush1.bf16.msra.mxu0 %v3815_v63  ;;  %1613 = vmatpush1.bf16.msra.mxu1 %v3817_v2 }
 0x190   : > { %1571 = vmatprep.subr.bf16.mxu0 %v3792_v3  ;;  %1614 = vmatprep.subr.bf16.mxu1 %v3794_v4 }
 0x193   : > { %1572 = vmatpush1.bf16.msra.mxu0 %v3791_v11  ;;  %1615 = vmatpush1.bf16.msra.mxu1 %v3793_v13 }
 0x194   : > { %1573 = vmatprep.subr.bf16.mxu0 %v3768_v14  ;;  %1616 = vmatprep.subr.bf16.mxu1 %v3770_v15 }
 0x197   : > { %1574 = vmatpush1.bf16.msra.mxu0 %v3767_v8  ;;  %1617 = vmatpush1.bf16.msra.mxu1 %v3769_v21 }
 0x198   : > { %1653 = vmatprep.subr.bf16.mxu0 %v3844_v22  ;;  %1696 = vmatprep.subr.bf16.mxu1 %v3846_v23 }
 0x19a   : > { %3855 = vmatmul.mubr.msk.bf16.vlgmr.msra.gmra.mxu0 %vm691_vm1, %v4611_v20  ;;  %3856 = vmatmul.mubr.msk.bf16.vlgmr.msra.gmra.mxu1 %vm691_vm1, %v4611_v20 }
 0x19b   : > { %1654 = vmatpush1.bf16.msra.mxu0 %v3843_v27  ;;  %1697 = vmatpush1.bf16.msra.mxu1 %v3845_v28 }
 0x19c   : > { %1655 = vmatprep.subr.bf16.mxu0 %v3820_v29  ;;  %1698 = vmatprep.subr.bf16.mxu1 %v3822_v30 }
 0x19d   : > { %1677 = vmatprep.mubr.bf16.mxu0 %v4457_v56  ;;  %1720 = vmatprep.mubr.bf16.mxu1 %v4457_v56 }
 0x19f   : > { %1656 = vmatpush1.bf16.msra.mxu0 %v3819_v35  ;;  %1699 = vmatpush1.bf16.msra.mxu1 %v3821_v36 }
 0x1a0   : > { %1657 = vmatprep.subr.bf16.mxu0 %v3796_v37  ;;  %1700 = vmatprep.subr.bf16.mxu1 %v3798_v38 }
 0x1a3   : > { %1658 = vmatpush1.bf16.msra.mxu0 %v3795_v43  ;;  %1701 = vmatpush1.bf16.msra.mxu1 %v3797_v44 }
 0x1a4   : > { %1659 = vmatprep.subr.bf16.mxu0 %v3772_v45  ;;  %1702 = vmatprep.subr.bf16.mxu1 %v3774_v46 }
 0x1a7   : > { %1660 = vmatpush1.bf16.msra.mxu0 %v3771_v47  ;;  %1703 = vmatpush1.bf16.msra.mxu1 %v3773_v48 }
 0x1a8   : > { %4117 = vmatprep.subr.bf16.mxu0 %v4458_v49  ;;  %4135 = vmatprep.subr.bf16.mxu1 %v4458_v49 }
 0x1aa   : > { %3857 = vmatmul.mubr.msk.bf16.vlgmr.msra.gmra.mxu0 %vm691_vm1, %v4611_v20  ;;  %3858 = vmatmul.mubr.msk.bf16.vlgmr.msra.gmra.mxu1 %vm691_vm1, %v4611_v20 }
 0x1ab   : > { %4119 = vmatprep.mubr.msk.bf16.mxu0 %vm4459_vm2, %v4458_v49  ;;  %4137 = vmatprep.mubr.msk.bf16.mxu1 %vm4459_vm2, %v4458_v49 }
 0x21a   : > { %v1249_v50 = vpop.f32.mrf.mxu0  ;;  %v1292_v51 = vpop.f32.mrf.mxu1 }
 0x21c   : > { %v1251_v52 = vpop.f32.mrf.mxu0  ;;  %v1294_v53 = vpop.f32.mrf.mxu1 }
 0x21e   : > { %v1253_v54 = vpop.f32.mrf.mxu0  ;;  %v1296_v55 = vpop.f32.mrf.mxu1 }
 0x21f   : > { %v1731_v17 = vpack.c.bf16 %v1253_v54, %v1249_v50  ;;  %v1733_v29 = vpack.c.bf16 %v1296_v55, %v1292_v51 }
 0x220   : > { %v1255_v57 = vpop.f32.mrf.mxu0  ;;  %v1298_v20 = vpop.f32.mrf.mxu1 }
 0x221   : > { %v1734_v19 = vpack.c.bf16 %v1298_v20, %v1294_v53  ;;  %v1732_v23 = vpack.c.bf16 %v1255_v57, %v1251_v52 }
 0x22a   : > { %v4725_v58 = vpop.f32.mrf.mxu0  ;;  %v4727_v59 = vpop.f32.mrf.mxu1 }
 0x22c   : > { %v1337_v60 = vpop.f32.mrf.mxu0  ;;  %v4729_v61 = vpop.f32.mrf.mxu1 }
 0x22e   : > { %v4731_v62 = vpop.f32.mrf.mxu0  ;;  %v4733_v63 = vpop.f32.mrf.mxu1 }
 0x22f   : > { %v1735_v38 = vpack.c.bf16 %v4731_v62, %v4725_v58  ;;  %v1737_v48 = vpack.c.bf16 %v4733_v63, %v4727_v59 }
 0x230   : > { %v1341_v2 = vpop.f32.mrf.mxu0  ;;  %v4735_v3 = vpop.f32.mrf.mxu1 }
 0x231   : > { %v1736_v32 = vpack.c.bf16 %v1341_v2, %v1337_v60  ;;  %v1738_v43 = vpack.c.bf16 %v4735_v3, %v4729_v61 }
 0x23a   : > { %v1421_v4 = vpop.f32.mrf.mxu0  ;;  %v1464_v6 = vpop.f32.mrf.mxu1 }
 0x23c   : > { %v1423_v7 = vpop.f32.mrf.mxu0  ;;  %v1466_v9 = vpop.f32.mrf.mxu1 }
 0x23e   : > { %v1425_v10 = vpop.f32.mrf.mxu0  ;;  %v1468_v11 = vpop.f32.mrf.mxu1 }
 0x23f   : > { %v1739_v13 = vpack.c.bf16 %v1425_v10, %v1421_v4  ;;  %v1741_v12 = vpack.c.bf16 %v1468_v11, %v1464_v6 }
 0x240   : > { %v1470_v14 = vpop.f32.mrf.mxu1  ;;  %v1427_v16 = vpop.f32.mrf.mxu0 }
 0x241   : > { %v1742_v15 = vpack.c.bf16 %v1470_v14, %v1466_v9  ;;  %4118 = vmatpush3.bf16.xpose.msra.mxu0 %v1739_v13  ;;  %v1740_v18 = vpack.c.bf16 %v1427_v16, %v1423_v7  ;;  %v1755_v7 = vld [vmem:[%s5145_s1] sm:$0xff]  ;;  %v1756_v16 = vld [vmem:[%s5145_s1 + $0x8] sm:$0xff] }
 0x242   : > { %4123 = vmatprep.subr.bf16.mxu0 %v4458_v49 }
 0x243   : > { %4136 = vmatpush3.bf16.xpose.msra.mxu1 %v1742_v15 }
 0x244   : > { %4147 = vmatprep.subr.bf16.mxu1 %v4458_v49 }
 0x248   : > { %4120 = vmatmul.mubr.bf16.vlgmr.msra.gmra.mxu0 %v1731_v17 }
 0x249   : > { %4124 = vmatpush3.bf16.xpose.msra.mxu0 %v1740_v18  ;;  %4125 = vmatprep.mubr.msk.bf16.mxu0 %vm4459_vm2, %v4458_v49 }
 0x24a   : > { %v1507_v8 = vpop.f32.mrf.mxu0  ;;  %v1550_v21 = vpop.f32.mrf.mxu1  ;;  %4138 = vmatmul.mubr.bf16.vlgmr.msra.gmra.mxu1 %v1734_v19  ;;  %4129 = vmatprep.subr.bf16.mxu0 %v4458_v49 }
 0x24b   : > { %4149 = vmatprep.mubr.msk.bf16.mxu1 %vm4459_vm2, %v4458_v49 }
 0x24c   : > { %v1509_v22 = vpop.f32.mrf.mxu0  ;;  %v1552_v24 = vpop.f32.mrf.mxu1 }
 0x24e   : > { %v1511_v25 = vpop.f32.mrf.mxu0  ;;  %v1554_v28 = vpop.f32.mrf.mxu1 }
 0x24f   : > { %v1743_v31 = vpack.c.bf16 %v1511_v25, %v1507_v8  ;;  %v1745_v41 = vpack.c.bf16 %v1554_v28, %v1550_v21 }
 0x250   : > { %v1513_v26 = vpop.f32.mrf.mxu0  ;;  %4126 = vmatmul.mubr.bf16.vlgmr.msra.gmra.mxu0 %v1732_v23  ;;  %v1556_v30 = vpop.f32.mrf.mxu1 }
 0x251   : > { %v1744_v27 = vpack.c.bf16 %v1513_v26, %v1509_v22  ;;  %4130 = vmatpush3.bf16.xpose.msra.mxu0 %v1741_v12  ;;  %4131 = vmatprep.mubr.msk.bf16.mxu0 %vm4459_vm2, %v4458_v49  ;;  %v1746_v33 = vpack.c.bf16 %v1556_v30, %v1552_v24 }
 0x252   : > { %4141 = vmatprep.subr.bf16.mxu0 %v4458_v49 }
 0x253   : > { %4148 = vmatpush3.bf16.xpose.msra.mxu1 %v1744_v27 }
 0x254   : > { %4159 = vmatprep.subr.bf16.mxu1 %v4458_v49 }
 0x258   : > { %4132 = vmatmul.mubr.bf16.vlgmr.msra.gmra.mxu0 %v1733_v29 }
 0x259   : > { %4142 = vmatpush3.bf16.xpose.msra.mxu0 %v1743_v31  ;;  %4143 = vmatprep.mubr.msk.bf16.mxu0 %vm4459_vm2, %v4458_v49 }
 0x25a   : > { %v1593_v34 = vpop.f32.mrf.mxu0  ;;  %v4750_v35 = vpop.f32.mrf.mxu1  ;;  %4150 = vmatmul.mubr.bf16.vlgmr.msra.gmra.mxu1 %v1736_v32  ;;  %4153 = vmatprep.subr.bf16.mxu0 %v4458_v49 }
 0x25b   : > { %4160 = vmatpush3.bf16.xpose.msra.mxu1 %v1746_v33  ;;  %4161 = vmatprep.mubr.msk.bf16.mxu1 %vm4459_vm2, %v4458_v49 }
 0x25c   : > { %v1595_v36 = vpop.f32.mrf.mxu0  ;;  %v4755_v37 = vpop.f32.mrf.mxu1  ;;  %4171 = vmatprep.subr.bf16.mxu1 %v4458_v49 }
 0x25e   : > { %v1597_v39 = vpop.f32.mrf.mxu0  ;;  %v4760_v40 = vpop.f32.mrf.mxu1 }
 0x25f   : > { %v1749_v42 = vpack.c.bf16 %v4760_v40, %v4750_v35  ;;  %v1747_v50 = vpack.c.bf16 %v1597_v39, %v1593_v34 }
 0x260   : > { %v1599_v44 = vpop.f32.mrf.mxu0  ;;  %v4766_v45 = vpop.f32.mrf.mxu1  ;;  %4144 = vmatmul.mubr.bf16.vlgmr.msra.gmra.mxu0 %v1735_v38 }
 0x261   : > { %v1748_v46 = vpack.c.bf16 %v1599_v44, %v1595_v36  ;;  %v1750_v47 = vpack.c.bf16 %v4766_v45, %v4755_v37  ;;  %4154 = vmatpush3.bf16.xpose.msra.mxu0 %v1745_v41  ;;  %4155 = vmatprep.mubr.msk.bf16.mxu0 %vm4459_vm2, %v4458_v49 }
 0x262   : > { %4162 = vmatmul.mubr.bf16.vlgmr.msra.gmra.mxu1 %v1738_v43  ;;  %4165 = vmatprep.subr.bf16.mxu0 %v4458_v49 }
 0x263   : > { %4172 = vmatpush3.bf16.msra.mxu1 %v1748_v46  ;;  %4173 = vmatprep.mubr.msk.bf16.mxu1 %vm4459_vm2, %v4458_v49 }
 0x264   : > { %4183 = vmatprep.subr.bf16.mxu1 %v4458_v49 }
 0x268   : > { %4156 = vmatmul.mubr.bf16.vlgmr.msra.gmra.mxu0 %v1737_v48 }
 0x269   : > { %4166 = vmatpush3.bf16.msra.mxu0 %v1747_v50  ;;  %4167 = vmatprep.mubr.msk.bf16.mxu0 %vm4459_vm2, %v4458_v49 }
 0x26a   : > { %v4780_v51 = vpop.f32.mrf.mxu0  ;;  %v4782_v52 = vpop.f32.mrf.mxu1  ;;  %4177 = vmatprep.subr.bf16.mxu0 %v4458_v49 }
 0x26c   : > { %v4785_v53 = vpop.f32.mrf.mxu0  ;;  %v4787_v54 = vpop.f32.mrf.mxu1 }
 0x26e   : > { %v4789_v55 = vpop.f32.mrf.mxu0  ;;  %v4791_v57 = vpop.f32.mrf.mxu1 }
 0x26f   : > { %v1751_v20 = vpack.c.bf16 %v4789_v55, %v4780_v51  ;;  %v1753_v58 = vpack.c.bf16 %v4791_v57, %v4782_v52 }
 0x270   : > { %v4797_v59 = vpop.f32.mrf.mxu0  ;;  %v4799_v60 = vpop.f32.mrf.mxu1 }
 0x308   : > { %v1791_v61 = vpop.f32.mrf.mxu0 }
 0x309   : > { %v4806_v14 = vadd.f32 %v1791_v61, %v1755_v7 }
 0x30a   : > { %v4121_v62 = vpop.f32.mrf.mxu0  ;;  %v1914_v63 = vpop.f32.mrf.mxu1 }
 0x30b   : > { %v4815_v8 = vadd.f32 %v1914_v63, %v1755_v7  ;;  %v2086_v22 = vsel %vm2085_vm3, %v4806_v14, -inf }
 0x30c   : > { %v1794_v2 = vpop.f32.mrf.mxu0  ;;  %v4139_v3 = vpop.f32.mrf.mxu1 }
 0x30d   : > { %v4817_v21 = vadd.f32 %v1794_v2, %v1756_v16  ;;  %v2104_v28 = vsel %vm2085_vm3, %v4815_v8, -inf }
 0x30e   : > { %v4122_v4 = vpop.f32.mrf.mxu0  ;;  %v1917_v6 = vpop.f32.mrf.mxu1 }
 0x30f   : > { %v4823_v26 = vadd.f32 %v1917_v6, %v1756_v16  ;;  %v2089_v29 = vsel %vm2085_vm3, %v4817_v21, -inf }
 0x310   : > { %v1832_v9 = vpop.f32.mrf.mxu0  ;;  %v4140_v10 = vpop.f32.mrf.mxu1 }
 0x311   : > { %v4804_v11 = vadd.f32 %v1832_v9, %v1755_v7  ;;  %v2107_v38 = vsel %vm2085_vm3, %v4823_v26, -inf }
 0x312   : > { %v4127_v13 = vpop.f32.mrf.mxu0 }
 0x313   : > { %v2092_v15 = vsel %vm2085_vm3, %v4804_v11, -inf }
 0x314   : > { %2093 = vmax.xlane.f32.xlu0 %v2092_v15  ;;  %v1835_v17 = vpop.f32.mrf.mxu0 }
 0x315   : > { %v4813_v18 = vadd.f32 %v1835_v17, %v1756_v16 }
 0x316   : > { %v4128_v19 = vpop.f32.mrf.mxu0 }
 0x317   : > { %v2095_v23 = vsel %vm2085_vm3, %v4813_v18, -inf }
 0x318   : > { %2087 = vmax.xlane.f32.xlu0 %v2086_v22  ;;  %2096 = vmax.xlane.f32.xlu1 %v2095_v23  ;;  %v1873_v24 = vpop.f32.mrf.mxu0 }
 0x319   : > { %v4825_v27 = vadd.f32 %v1873_v24, %v1755_v7 }
 0x31a   : > { %v4133_v25 = vpop.f32.mrf.mxu0  ;;  %v1996_v12 = vpop.f32.mrf.mxu1 }
 0x31b   : > { %v4831_v34 = vadd.f32 %v1996_v12, %v1755_v7  ;;  %v2098_v39 = vsel %vm2085_vm3, %v4825_v27, -inf }
 0x31c   : > { %v4151_v30 = vpop.f32.mrf.mxu1  ;;  %2105 = vmax.xlane.f32.xlu0 %v2104_v28  ;;  %2090 = vmax.xlane.f32.xlu1 %v2089_v29  ;;  %v1876_v31 = vpop.f32.mrf.mxu0 }
 0x31d   : > { %v4833_v36 = vadd.f32 %v1876_v31, %v1756_v16  ;;  %v2116_v61 = vsel %vm2085_vm3, %v4831_v34, -inf }
 0x31e   : > { %v4134_v32 = vpop.f32.mrf.mxu0  ;;  %v1999_v33 = vpop.f32.mrf.mxu1 }
 0x31f   : > { %v4839_v48 = vadd.f32 %v1999_v33, %v1756_v16  ;;  %v2101_v62 = vsel %vm2085_vm3, %v4833_v36, -inf }
 0x320   : > { %v4152_v41 = vpop.f32.mrf.mxu1  ;;  %2108 = vmax.xlane.f32.xlu1 %v2107_v38  ;;  %2099 = vmax.xlane.f32.xlu0 %v2098_v39  ;;  %v1955_v43 = vpop.f32.mrf.mxu0 }
 0x321   : > { %v4841_v50 = vadd.f32 %v1955_v43, %v1755_v7  ;;  %v2119_v10 = vsel %vm2085_vm3, %v4839_v48, -inf }
 0x322   : > { %v4145_v44 = vpop.f32.mrf.mxu0  ;;  %v2078_v46 = vpop.f32.mrf.mxu1 }
 0x323   : > { %v4847_v6 = vadd.f32 %v2078_v46, %v1755_v7  ;;  %v2110_v13 = vsel %vm2085_vm3, %v4841_v50, -inf }
 0x324   : > { %v4163_v63 = vpop.f32.mrf.mxu1  ;;  %2117 = vmax.xlane.f32.xlu0 %v2116_v61  ;;  %2102 = vmax.xlane.f32.xlu1 %v2101_v62  ;;  %v1958_v2 = vpop.f32.mrf.mxu0 }
 0x325   : > { %v4849_v9 = vadd.f32 %v1958_v2, %v1756_v16  ;;  %v2128_v24 = vsel %vm2085_vm3, %v4847_v6, -inf }
 0x326   : > { %v4146_v3 = vpop.f32.mrf.mxu0  ;;  %v2081_v4 = vpop.f32.mrf.mxu1 }
 0x327   : > { %v4855_v22 = vadd.f32 %v2081_v4, %v1756_v16  ;;  %v2113_v25 = vsel %vm2085_vm3, %v4849_v9, -inf }
 0x328   : > { %v4164_v15 = vpop.f32.mrf.mxu1  ;;  %2120 = vmax.xlane.f32.xlu1 %v2119_v10  ;;  %2111 = vmax.xlane.f32.xlu0 %v2110_v13  ;;  %v2037_v17 = vpop.f32.mrf.mxu0 }
 0x329   : > { %v4857_v23 = vadd.f32 %v2037_v17, %v1755_v7  ;;  %v2131_v30 = vsel %vm2085_vm3, %v4855_v22, -inf }
 0x32a   : > { %v4157_v19 = vpop.f32.mrf.mxu0 }
 0x32b   : > { %v2122_v31 = vsel %vm2085_vm3, %v4857_v23, -inf }
 0x32c   : > { %2129 = vmax.xlane.f32.xlu0 %v2128_v24  ;;  %2114 = vmax.xlane.f32.xlu1 %v2113_v25  ;;  %v2040_v12 = vpop.f32.mrf.mxu0 }
 0x32d   : > { %v4863_v29 = vadd.f32 %v2040_v12, %v1756_v16 }
 0x32e   : > { %v4158_v28 = vpop.f32.mrf.mxu0 }
 0x32f   : > { %v2125_v7 = vsel %vm2085_vm3, %v4863_v29, -inf }
 0x330   : > { %2132 = vmax.xlane.f32.xlu1 %v2131_v30  ;;  %2123 = vmax.xlane.f32.xlu0 %v2122_v31 }
 0x334   : > { %2126 = vmax.xlane.f32.xlu1 %v2125_v7 }
 0x39d   : > { %v2094_v32 = vpop.xlane.xlu0 %2093 }
 0x39e   : > { %v2136_v33 = vsub.f32 %v4804_v11, %v2094_v32 }
 0x3a0   : > { %v2154_v38 = vmul.f32 1.442695, %v2136_v33 }
 0x3a1   : > { %v2088_v39 = vpop.xlane.xlu0 %2087  ;;  %v2097_v41 = vpop.xlane.xlu1 %2096 }
 0x3a2   : > { %v2134_v16 = vsub.f32 %v4806_v14, %v2088_v39  ;;  %v2137_v43 = vsub.f32 %v4813_v18, %v2097_v41  ;;  %4330 = vpow2.f32 %v2154_v38 }
 0x3a4   : > { %v2150_v44 = vmul.f32 1.442695, %v2134_v16  ;;  %v2156_v46 = vmul.f32 1.442695, %v2137_v43 }
 0x3a5   : > { %v2106_v61 = vpop.xlane.xlu0 %2105  ;;  %v2091_v62 = vpop.xlane.xlu1 %2090 }
 0x3a6   : > { %4332 = vpow2.f32 %v2150_v44  ;;  %v2140_v63 = vsub.f32 %v4815_v8, %v2106_v61  ;;  %v2135_v2 = vsub.f32 %v4817_v21, %v2091_v62 }
 0x3a7   : > { %4334 = vpow2.f32 %v2156_v46 }
 0x3a8   : > { %v2162_v3 = vmul.f32 1.442695, %v2140_v63  ;;  %v2152_v11 = vmul.f32 1.442695, %v2135_v2 }
 0x3a9   : > { %v2109_v4 = vpop.xlane.xlu1 %2108  ;;  %v2100_v10 = vpop.xlane.xlu0 %2099 }
 0x3aa   : > { %4336 = vpow2.f32 %v2162_v3  ;;  %v2141_v14 = vsub.f32 %v4823_v26, %v2109_v4  ;;  %v2138_v18 = vsub.f32 %v4825_v27, %v2100_v10  ;;  %v1752_v10 = vpack.c.bf16 %v4797_v59, %v4785_v53 }
 0x3ab   : > { %4338 = vpow2.f32 %v2152_v11 }
 0x3ac   : > { %v2164_v13 = vmul.f32 1.442695, %v2141_v14  ;;  %v2158_v15 = vmul.f32 1.442695, %v2138_v18 }
 0x3ad   : > { %v2118_v17 = vpop.xlane.xlu0 %2117  ;;  %v2103_v19 = vpop.xlane.xlu1 %2102 }
 0x3ae   : > { %4340 = vpow2.f32 %v2164_v13  ;;  %v2144_v8 = vsub.f32 %v4831_v34, %v2118_v17  ;;  %v2139_v21 = vsub.f32 %v4833_v36, %v2103_v19 }
 0x3af   : > { %4342 = vpow2.f32 %v2158_v15  ;;  %v4331_v30 = vpop.eup %4330 }
 0x3b0   : > { %v2170_v24 = vmul.f32 1.442695, %v2144_v8  ;;  %v2160_v25 = vmul.f32 1.442695, %v2139_v21  ;;  %v2188_v45 = vsel %vm2085_vm3, %v4331_v30, 0.0  ;;  %v1754_v8 = vpack.c.bf16 %v4799_v60, %v4787_v54 }
 0x3b1   : > { %v2121_v12 = vpop.xlane.xlu1 %2120  ;;  %v2112_v28 = vpop.xlane.xlu0 %2111 }
 0x3b2   : > { %v2145_v26 = vsub.f32 %v4839_v48, %v2121_v12  ;;  %v2142_v27 = vsub.f32 %v4841_v50, %v2112_v28  ;;  %4344 = vpow2.f32 %v2160_v25 }
 0x3b3   : > { %v4333_v31 = vpop.eup %4332  ;;  %4346 = vpow2.f32 %v2170_v24 }
 0x3b4   : > { %v4335_v7 = vpop.eup %4334  ;;  %v2172_v32 = vmul.f32 1.442695, %v2145_v26  ;;  %v2166_v33 = vmul.f32 1.442695, %v2142_v27  ;;  %v2182_v34 = vsel %vm2085_vm3, %v4333_v31, 0.0  ;;  %v4234_v26 = vld [vmem:[%s4528_s16 + $0x78] sm:$0xff]  }
 0x3b5   : > { %v2130_v38 = vpop.xlane.xlu0 %2129  ;;  %v2115_v36 = vpop.xlane.xlu1 %2114  ;;  %2183 = vadd.xlane.f32.xlu0 %v2182_v34  ;;  %v2247_v39 = vpack.c.bf16 %v4335_v7, %v4331_v30  ;;  %v2191_v13 = vsel %vm2085_vm3, %v4335_v7, 0.0  ;;  %v4235_v27 = vld [vmem:[%s4528_s16 + $0x38] sm:$0xff]   ;;  %v4243_v34 = vld [vmem:[%s4528_s16 + $0xf0] sm:$0xff]  }
 0x3b6   : > { %4348 = vpow2.f32 %v2172_v32  ;;  %v2148_v41 = vsub.f32 %v4847_v6, %v2130_v38  ;;  %v2143_v16 = vsub.f32 %v4849_v9, %v2115_v36  ;;  %v4239_v7 = vld [vmem:[%s4528_s16 + $0xf8] sm:$0xff]   ;;  %v4238_v38 = vld [vmem:[%s4528_s16 + $0x68] sm:$0xff]   ;;  %v4245_v36 = vld [vmem:[%s4528_s16 + $0xb0] sm:$0xff]  }
 0x3b7   : > { %v4337_v48 = vpop.eup %4336  ;;  %4174 = vmatmul.mubr.msk.bf16.vlgmr.msra.gmra.mxu1 %vm2085_vm3, %v2247_v39  ;;  %4350 = vpow2.f32 %v2166_v33  ;;  %v4241_v32 = vld [vmem:[%s4528_s16 + $0xb8] sm:$0xff]   ;;  %v4237_v33 = vld [vmem:[%s4528_s16 + $0x30] sm:$0xff]   ;;  %v4247_v39 = vld [vmem:[%s4528_s16 + $0xe8] sm:$0xff]  }
 0x3b8   : > { %v4339_v50 = vpop.eup %4338  ;;  %v2178_v43 = vmul.f32 1.442695, %v2148_v41  ;;  %v2168_v44 = vmul.f32 1.442695, %v2143_v16  ;;  %4184 = vmatpush3.bf16.msra.mxu1 %v1750_v47  ;;  %v2200_v46 = vsel %vm2085_vm3, %v4337_v48, 0.0  ;;  %4185 = vmatprep.mubr.msk.bf16.mxu1 %vm4459_vm2, %v4458_v49  ;;  %v4240_v41 = vld [vmem:[%s4528_s16 + $0x28] sm:$0xff]  }
 0x3b9   : > { %v2133_v61 = vpop.xlane.xlu1 %2132  ;;  %2201 = vadd.xlane.f32.xlu0 %v2200_v46  ;;  %v2124_v6 = vpop.xlane.xlu0 %2123  ;;  %v2185_v9 = vsel %vm2085_vm3, %v4339_v50, 0.0  ;;  %v2246_v62 = vpack.c.bf16 %v4339_v50, %v4333_v31  ;;  %4195 = vmatprep.subr.bf16.mxu1 %v4458_v49  ;;  %v4236_v31 = vld [vmem:[%s4528_s16 + $0x70] sm:$0xff]   ;;  %v4242_v16 = vld [vmem:[%s4528_s16 + $0x60] sm:$0xff]  }
 0x3ba   : > { %4352 = vpow2.f32 %v2178_v43  ;;  %v2149_v63 = vsub.f32 %v4855_v22, %v2133_v61  ;;  %v2146_v2 = vsub.f32 %v4857_v23, %v2124_v6  ;;  %2186 = vadd.xlane.f32.xlu1 %v2185_v9  ;;  %v4244_v50 = vld [vmem:[%s4528_s16 + $0x20] sm:$0xff]   ;;  %v4246_v43 = vld [vmem:[%s4528_s16 + $0x58] sm:$0xff]   ;;  %v4250_v46 = vld [vmem:[%s4528_s16 + $0x50] sm:$0xff]  }
 0x3bb   : > { %v4341_v37 = vpop.eup %4340  ;;  %4354 = vpow2.f32 %v2168_v44  ;;  %4168 = vmatmul.mubr.msk.bf16.vlgmr.msra.gmra.mxu0 %vm2085_vm3, %v2246_v62  ;;  %v4248_v44 = vld [vmem:[%s4528_s16 + $0x18] sm:$0xff]   ;;  %v4251_v61 = vld [vmem:[%s4528_s16 + $0xe0] sm:$0xff]   ;;  %v4252_v6 = vld [vmem:[%s4528_s16 + $0x10] sm:$0xff]  }
 0x3bc   : > { %v2180_v47 = vmul.f32 1.442695, %v2149_v63  ;;  %v2174_v3 = vmul.f32 1.442695, %v2146_v2  ;;  %4178 = vmatpush3.bf16.msra.mxu0 %v1749_v42  ;;  %v2203_v11 = vsel %vm2085_vm3, %v4341_v37, 0.0  ;;  %v2249_v4 = vpack.c.bf16 %v4341_v37, %v4337_v48  ;;  %4179 = vmatprep.mubr.msk.bf16.mxu0 %vm4459_vm2, %v4458_v49  ;;  %v4343_v22 = vpop.eup %4342  ;;  %v4249_v48 = vld [vmem:[%s4528_s16 + $0xa8] sm:$0xff]  }
 0x3bd   : > { %2189 = vadd.xlane.f32.xlu0 %v2188_v45  ;;  %v2127_v23 = vpop.xlane.xlu1 %2126  ;;  %4189 = vmatprep.subr.bf16.mxu0 %v4458_v49  ;;  %v2194_v42 = vsel %vm2085_vm3, %v4343_v22, 0.0  ;;  %v4253_v9 = vld [vmem:[%s4528_s16 + $0xa0] sm:$0xff]   ;;  %v4254_v62 = vld [vmem:[%s4528_s16 + $0x48] sm:$0xff]   ;;  %v4255_v63 = vld [vmem:[%s4528_s16 + $0xd8] sm:$0xff]  }
 0x3be   : > { %4356 = vpow2.f32 %v2180_v47  ;;  %2204 = vadd.xlane.f32.xlu1 %v2203_v11  ;;  %v2147_v14 = vsub.f32 %v4863_v29, %v2127_v23  ;;  %v4256_v2 = vld [vmem:[%s4528_s16 + $0x8] sm:$0xff]   ;;  %v4257_v37 = vld [vmem:[%s4528_s16 + $0x98] sm:$0xff]   ;;  %v4258_v45 = vld [vmem:[%s4528_s16 + $0x40] sm:$0xff]  }
 0x3bf   : > { %4186 = vmatmul.mubr.msk.bf16.vlgmr.msra.gmra.mxu1 %vm2085_vm3, %v2249_v4  ;;  %v4345_v35 = vpop.eup %4344  ;;  %4358 = vpow2.f32 %v2174_v3  ;;  %v4259_v47 = vld [vmem:[%s4528_s16 + $0xd0] sm:$0xff]   ;;  %v4260_v3 = vld [vmem:[%s4528_s16] sm:$0xff]   ;;  %v4262_v4 = vld [vmem:[%s4528_s16 + $0xc8] sm:$0xff]  }
 0x3c0   : > { %v2176_v40 = vmul.f32 1.442695, %v2147_v14  ;;  %4196 = vmatpush3.bf16.msra.mxu1 %v1752_v10  ;;  %4197 = vmatprep.mubr.msk.bf16.mxu1 %vm4459_vm2, %v4458_v49  ;;  %v4347_v18 = vpop.eup %4346  ;;  %v2248_v53 = vpack.c.bf16 %v4345_v35, %v4343_v22  ;;  %v2197_v19 = vsel %vm2085_vm3, %v4345_v35, 0.0  ;;  %v4261_v11 = vld [vmem:[%s4528_s16 + $0x90] sm:$0xff]   ;;  %v4263_v22 = vld [vmem:[%s4528_s16 + $0x178] sm:$0xff]   ;;  %v4264_v23 = vld [vmem:[%s4528_s16 + $0x88] sm:$0xff]  }
 0x3c1   : > { %2195 = vadd.xlane.f32.xlu0 %v2194_v42  ;;  %4207 = vmatprep.subr.bf16.mxu1 %v4458_v49  ;;  %v2212_v29 = vsel %vm2085_vm3, %v4347_v18, 0.0  ;;  %v4266_v10 = vld [vmem:[%s4528_s16 + $0xc0] sm:$0xff]   ;;  %v4271_v35 = vld [vmem:[%s4528_s16 + $0x1f8] sm:$0xff]  }
 0x3c2   : > { %4360 = vpow2.f32 %v2176_v40  ;;  %2192 = vadd.xlane.f32.xlu1 %v2191_v13  ;;  %v4268_v14 = vld [vmem:[%s4528_s16 + $0x80] sm:$0xff]  }
 0x3c3   : > { %v4349_v59 = vpop.eup %4348  ;;  %4180 = vmatmul.mubr.msk.bf16.vlgmr.msra.gmra.mxu0 %vm2085_vm3, %v2248_v53 }
 0x3c4   : > { %4190 = vmatpush3.bf16.msra.mxu0 %v1751_v20  ;;  %v2251_v15 = vpack.c.bf16 %v4349_v59, %v4347_v18  ;;  %4191 = vmatprep.mubr.msk.bf16.mxu0 %vm4459_vm2, %v4458_v49  ;;  %v4351_v17 = vpop.eup %4350  ;;  %v2215_v20 = vsel %vm2085_vm3, %v4349_v59, 0.0 }
 0x3c5   : > { %2213 = vadd.xlane.f32.xlu0 %v2212_v29  ;;  %4201 = vmatprep.subr.bf16.mxu0 %v4458_v49  ;;  %v2206_v55 = vsel %vm2085_vm3, %v4351_v17, 0.0 }
 0x3c6   : > { %2198 = vadd.xlane.f32.xlu1 %v2197_v19 }
 0x3c7   : > { %v4353_v21 = vpop.eup %4352  ;;  %4198 = vmatmul.mubr.msk.bf16.vlgmr.msra.gmra.mxu1 %vm2085_vm3, %v2251_v15 }
 0x3c8   : > { %v4355_v51 = vpop.eup %4354  ;;  %4208 = vmatpush3.bf16.msra.mxu1 %v1754_v8  ;;  %4209 = vmatprep.mubr.msk.bf16.mxu1 %vm4459_vm2, %v4458_v49  ;;  %v2224_v54 = vsel %vm2085_vm3, %v4353_v21, 0.0 }
 0x3c9   : > { %2207 = vadd.xlane.f32.xlu0 %v2206_v55  ;;  %v2250_v24 = vpack.c.bf16 %v4355_v51, %v4351_v17  ;;  %v2209_v28 = vsel %vm2085_vm3, %v4355_v51, 0.0  ;;  %4029 = vmatprep.subr.bf16.mxu1 %v4239_v7 }
 0x3ca   : > { %2216 = vadd.xlane.f32.xlu1 %v2215_v20 }
 0x3cb   : > { %v4357_v25 = vpop.eup %4356  ;;  %4192 = vmatmul.mubr.msk.bf16.vlgmr.msra.gmra.mxu0 %vm2085_vm3, %v2250_v24 }
 0x3cc   : > { %4202 = vmatpush3.bf16.msra.mxu0 %v1753_v58  ;;  %v2253_v60 = vpack.c.bf16 %v4357_v25, %v4353_v21  ;;  %4203 = vmatprep.mubr.msk.bf16.mxu0 %vm4459_vm2, %v4458_v49  ;;  %v4359_v12 = vpop.eup %4358  ;;  %v2227_v49 = vsel %vm2085_vm3, %v4357_v25, 0.0 }
 0x3cd   : > { %2225 = vadd.xlane.f32.xlu0 %v2224_v54  ;;  %v2218_v52 = vsel %vm2085_vm3, %v4359_v12, 0.0  ;;  %4007 = vmatprep.subr.bf16.mxu0 %v4234_v26 }
 0x3ce   : > { %2210 = vadd.xlane.f32.xlu1 %v2209_v28 }
 0x3cf   : > { %v4361_v30 = vpop.eup %4360  ;;  %4210 = vmatmul.mubr.msk.bf16.vlgmr.msra.gmra.mxu1 %vm2085_vm3, %v2253_v60 }
 0x3d0   : > { %v2252_v57 = vpack.c.bf16 %v4361_v30, %v4359_v12  ;;  %v2221_v58 = vsel %vm2085_vm3, %v4361_v30, 0.0  ;;  %4030 = vmatpush3.bf16.msra.mxu1 %v4241_v32 }
 0x3d1   : > { %2219 = vadd.xlane.f32.xlu0 %v2218_v52  ;;  %4031 = vmatprep.subr.bf16.mxu1 %v4243_v34 }
 0x3d2   : > { %2228 = vadd.xlane.f32.xlu1 %v2227_v49 }
 0x3d3   : > { %4204 = vmatmul.mubr.msk.bf16.vlgmr.msra.gmra.mxu0 %vm2085_vm3, %v2252_v57 }
 0x3d4   : > { %4008 = vmatpush3.bf16.msra.mxu0 %v4235_v27  ;;  %4032 = vmatpush3.bf16.msra.mxu1 %v4245_v36 }
 0x3d5   : > { %4009 = vmatprep.subr.bf16.mxu0 %v4236_v31  ;;  %4033 = vmatprep.subr.bf16.mxu1 %v4247_v39 }
 0x3d6   : > { %2222 = vadd.xlane.f32.xlu1 %v2221_v58 }
 0x3d8   : > { %4010 = vmatpush3.bf16.msra.mxu0 %v4237_v33  ;;  %4034 = vmatpush3.bf16.msra.mxu1 %v4249_v48  ;;  %v4265_v33 = vld [vmem:[%s4528_s16 + $0x138] sm:$0xff]  }
 0x3d9   : > { %4011 = vmatprep.subr.bf16.mxu0 %v4238_v38  ;;  %4035 = vmatprep.subr.bf16.mxu1 %v4251_v61 }
 0x3dc   : > { %4012 = vmatpush3.bf16.msra.mxu0 %v4240_v41  ;;  %4036 = vmatpush3.bf16.msra.mxu1 %v4253_v9  ;;  %v4267_v41 = vld [vmem:[%s4528_s16 + $0x170] sm:$0xff]  }
 0x3dd   : > { %4013 = vmatprep.subr.bf16.mxu0 %v4242_v16  ;;  %4037 = vmatprep.subr.bf16.mxu1 %v4255_v63  ;;  %v4270_v63 = vld [vmem:[%s4528_s16 + $0x168] sm:$0xff]  }
 0x3e0   : > { %4014 = vmatpush3.bf16.msra.mxu0 %v4244_v50  ;;  %4038 = vmatpush3.bf16.msra.mxu1 %v4257_v37 }
 0x3e1   : > { %4015 = vmatprep.subr.bf16.mxu0 %v4246_v43  ;;  %4039 = vmatprep.subr.bf16.mxu1 %v4259_v47 }
 0x3e4   : > { %4016 = vmatpush3.bf16.msra.mxu0 %v4248_v44  ;;  %4040 = vmatpush3.bf16.msra.mxu1 %v4261_v11 }
 0x3e5   : > { %4017 = vmatprep.subr.bf16.mxu0 %v4250_v46  ;;  %4041 = vmatprep.subr.bf16.mxu1 %v4262_v4 }
 0x3e8   : > { %4018 = vmatpush3.bf16.msra.mxu0 %v4252_v6  ;;  %4042 = vmatpush3.bf16.msra.mxu1 %v4264_v23  ;;  %v4269_v6 = vld [vmem:[%s4528_s16 + $0x130] sm:$0xff]   ;;  %v4273_v23 = vld [vmem:[%s4528_s16 + $0x1b8] sm:$0xff]  }
 0x3e9   : > { %4019 = vmatprep.subr.bf16.mxu0 %v4254_v62  ;;  %4043 = vmatprep.subr.bf16.mxu1 %v4266_v10 }
 0x3ec   : > { %4020 = vmatpush3.bf16.msra.mxu0 %v4256_v2  ;;  %4044 = vmatpush3.bf16.msra.mxu1 %v4268_v14 }
 0x3ed   : > { %4021 = vmatprep.subr.bf16.mxu0 %v4258_v45  ;;  %4073 = vmatprep.subr.bf16.mxu1 %v4271_v35  ;;  %v4274_v35 = vld [vmem:[%s4528_s16 + $0x160] sm:$0xff]  }
 0x3f0   : > { %4022 = vmatpush3.bf16.msra.mxu0 %v4260_v3 }
 0x3f1   : > { %4051 = vmatprep.subr.bf16.mxu0 %v4263_v22  ;;  %v4272_v22 = vld [vmem:[%s4528_s16 + $0x128] sm:$0xff]  }
 0x43e   : > { %v2184_v40 = vpop.xlane.xlu0 %2183 }
 0x442   : > { %v2202_v18 = vpop.xlane.xlu0 %2201 }
 0x443   : > { %v2187_v42 = vpop.xlane.xlu1 %2186 }
 0x446   : > { %v2190_v53 = vpop.xlane.xlu0 %2189 }
 0x447   : > { %v2205_v13 = vpop.xlane.xlu1 %2204  ;;  %4362 = vrcp.f32 %v2190_v53 }
 0x44a   : > { %v2196_v29 = vpop.xlane.xlu0 %2195 }
 0x44b   : > { %v2193_v59 = vpop.xlane.xlu1 %2192 }
 0x44c   : > { %4364 = vrcp.f32 %v2193_v59 }
 0x44d   : > { %4366 = vrcp.f32 %v2184_v40  ;;  %v4275_v40 = vld [vmem:[%s4528_s16 + $0x1f0] sm:$0xff]  }
 0x44e   : > { %4368 = vrcp.f32 %v2187_v42  ;;  %v2214_v17 = vpop.xlane.xlu0 %2213 }
 0x44f   : > { %v2199_v15 = vpop.xlane.xlu1 %2198  ;;  %4370 = vrcp.f32 %v2202_v18 }
 0x450   : > { %4372 = vrcp.f32 %v2205_v13 }
 0x451   : > { %4374 = vrcp.f32 %v2196_v29 }
 0x452   : > { %4376 = vrcp.f32 %v2199_v15  ;;  %v4977_v25 = vpop.xlane.xlu0 %2207 }
 0x453   : > { %v2217_v19 = vpop.xlane.xlu1 %2216  ;;  %4378 = vrcp.f32 %v2214_v17  ;;  %v4276_v17 = vld [vmem:[%s4528_s16 + $0x120] sm:$0xff]  }
 0x454   : > { %v4363_v51 = vpop.eup %4362  ;;  %4380 = vrcp.f32 %v2217_v19  ;;  %v4277_v19 = vld [vmem:[%s4528_s16 + $0x1b0] sm:$0xff]  }
 0x456   : > { %v2226_v38 = vpop.xlane.xlu0 %2225 }
 0x457   : > { %v4979_v54 = vpop.xlane.xlu1 %2210  ;;  %4382 = vrcp.f32 %v2226_v38  ;;  %v4286_v38 = vld [vmem:[%s4528_s16 + $0x148] sm:$0xff]  }
 0x459   : > { %v4365_v55 = vpop.eup %4364 }
 0x45a   : > { %v4367_v52 = vpop.eup %4366 }
 0x45b   : > { %v4369_v49 = vpop.eup %4368  ;;  %v2229_v36 = vpop.xlane.xlu1 %2228 }
 0x45c   : > { %v4371_v34 = vpop.eup %4370  ;;  %4384 = vrcp.f32 %v2229_v36  ;;  %v4287_v36 = vld [vmem:[%s4528_s16 + $0x1d8] sm:$0xff]  }
 0x45d   : > { %v4373_v16 = vpop.eup %4372  ;;  %4386 = vrcp.f32 %v4979_v54 }
 0x45e   : > { %v4375_v9 = vpop.eup %4374  ;;  %4388 = vrcp.f32 %v4977_v25  ;;  %v4284_v25 = vld [vmem:[%s4528_s16 + $0x110] sm:$0xff]  }
 0x45f   : > { %v4377_v2 = vpop.eup %4376 }
 0x460   : > { %v4379_v10 = vpop.eup %4378 }
 0x461   : > { %v4381_v42 = vpop.eup %4380 }
 0x477   : > { %v2335_v8 = vpop.f32.mrf.mxu1 }
 0x478   : > { %v2608_v60 = vmul.f32 %v4363_v51, %v2335_v8  ;;  %v4279_v51 = vld [vmem:[%s4528_s16 + $0x1e8] sm:$0xff]  }
 0x479   : > { %v4175_v21 = vpop.f32.mrf.mxu1 }
 0x47a   : > { %v4278_v21 = vld [vmem:[%s4528_s16 + $0x158] sm:$0xff]  }
 0x47b   : > { %v2291_v20 = vpop.f32.mrf.mxu0  ;;  %v2338_v24 = vpop.f32.mrf.mxu1 }
 0x47c   : > { %v2609_v12 = vmul.f32 %v4365_v55, %v2338_v24  ;;  %v2606_v27 = vmul.f32 %v4367_v52, %v2291_v20  ;;  %v4282_v52 = vld [vmem:[%s4528_s16 + $0x150] sm:$0xff]  }
 0x47d   : > { %v4169_v28 = vpop.f32.mrf.mxu0  ;;  %v4176_v30 = vpop.f32.mrf.mxu1 }
 0x47e   : > { %v2623_v57 = vpack.c.bf16 %v2609_v12, %v2608_v60  ;;  %v4280_v12 = vld [vmem:[%s4528_s16 + $0x118] sm:$0xff]   ;;  %v4281_v28 = vld [vmem:[%s4528_s16 + $0x1a8] sm:$0xff]   ;;  %v4383_v30 = vpop.eup %4382 }
 0x47f   : > { %v2294_v58 = vpop.f32.mrf.mxu0  ;;  %v2423_v26 = vpop.f32.mrf.mxu1 }
 0x480   : > { %v2607_v31 = vmul.f32 %v4369_v49, %v2294_v58  ;;  %3046 = vmatprep.mubr.bf16.mxu0 %v2623_v57  ;;  %v2612_v43 = vmul.f32 %v4371_v34, %v2423_v26  ;;  %v4283_v57 = vld [vmem:[%s4528_s16 + $0x1e0] sm:$0xff]   ;;  %v4385_v49 = vpop.eup %4384  ;;  %v2223_v26 = vpop.xlane.xlu1 %2222 }
 0x481   : > { %v4170_v7 = vpop.f32.mrf.mxu0  ;;  %v4187_v32 = vpop.f32.mrf.mxu1  ;;  %4390 = vrcp.f32 %v2223_v26 }
 0x482   : > { %v2622_v39 = vpack.c.bf16 %v2607_v31, %v2606_v27 }
 0x483   : > { %v2379_v48 = vpop.f32.mrf.mxu0  ;;  %v2426_v50 = vpop.f32.mrf.mxu1 }
 0x484   : > { %v2613_v44 = vmul.f32 %v4373_v16, %v2426_v50  ;;  %3047 = vmatmul.mubr.bf16.vlgmr.msra.gmra.mxu0 %v2622_v39  ;;  %v2610_v47 = vmul.f32 %v4375_v9, %v2379_v48  ;;  %v2220_v39 = vpop.xlane.xlu0 %2219  ;;  %v4288_v48 = vld [vmem:[%s4528_s16 + $0x108] sm:$0xff]   ;;  %v4289_v50 = vld [vmem:[%s4528_s16 + $0x198] sm:$0xff]  }
 0x485   : > { %4052 = vmatpush3.bf16.msra.mxu0 %v4265_v33  ;;  %v4181_v46 = vpop.f32.mrf.mxu0  ;;  %v4188_v61 = vpop.f32.mrf.mxu1  ;;  %v4285_v33 = vld [vmem:[%s4528_s16 + $0x1a0] sm:$0xff]   ;;  %4392 = vrcp.f32 %v2220_v39 }
 0x486   : > { %v2625_v62 = vpack.c.bf16 %v2613_v44, %v2612_v43  ;;  %4053 = vmatprep.subr.bf16.mxu0 %v4267_v41  ;;  %v4290_v43 = vld [vmem:[%s4528_s16 + $0x140] sm:$0xff]   ;;  %v4291_v44 = vld [vmem:[%s4528_s16 + $0x1d0] sm:$0xff]   ;;  %v4387_v46 = vpop.eup %4386 }
 0x487   : > { %v2382_v37 = vpop.f32.mrf.mxu0  ;;  %v2511_v45 = vpop.f32.mrf.mxu1  ;;  %v4292_v61 = vld [vmem:[%s4528_s16 + $0x100] sm:$0xff]  }
 0x488   : > { %v2611_v3 = vmul.f32 %v4377_v2, %v2382_v37  ;;  %3087 = vmatprep.mubr.bf16.mxu1 %v2625_v62  ;;  %v2616_v53 = vmul.f32 %v4379_v10, %v2511_v45  ;;  %v4294_v62 = vld [vmem:[%s4528_s16 + $0x1c8] sm:$0xff]  }
 0x489   : > { %4054 = vmatpush3.bf16.msra.mxu0 %v4269_v6  ;;  %v4182_v11 = vpop.f32.mrf.mxu0  ;;  %v4199_v4 = vpop.f32.mrf.mxu1  ;;  %v4293_v6 = vld [vmem:[%s4528_s16 + $0x190] sm:$0xff]   ;;  %v4295_v37 = vld [vmem:[%s4528_s16 + $0x188] sm:$0xff]  }
 0x48a   : > { %v2624_v14 = vpack.c.bf16 %v2611_v3, %v2610_v47  ;;  %4055 = vmatprep.subr.bf16.mxu0 %v4270_v63  ;;  %v4389_v63 = vpop.eup %4388  ;;  %v4296_v47 = vld [vmem:[%s4528_s16 + $0x1c0] sm:$0xff]  }
 0x48b   : > { %v4989_v18 = vpop.f32.mrf.mxu0  ;;  %v2514_v13 = vpop.f32.mrf.mxu1  ;;  %v4297_v11 = vld [vmem:[%s4528_s16 + $0x180] sm:$0xff]  }
 0x48c   : > { %v2617_v59 = vmul.f32 %v4381_v42, %v2514_v13  ;;  %3088 = vmatmul.mubr.bf16.vlgmr.msra.gmra.mxu1 %v2624_v14  ;;  %v2614_v2 = vmul.f32 %v4389_v63, %v4989_v18 }
 0x48d   : > { %4056 = vmatpush3.bf16.msra.mxu0 %v4272_v22  ;;  %4074 = vmatpush3.bf16.msra.mxu1 %v4273_v23  ;;  %v4193_v29 = vpop.f32.mrf.mxu0  ;;  %v4200_v15 = vpop.f32.mrf.mxu1 }
 0x48e   : > { %v2627_v8 = vpack.c.bf16 %v2617_v59, %v2616_v53  ;;  %4057 = vmatprep.subr.bf16.mxu0 %v4274_v35  ;;  %4075 = vmatprep.subr.bf16.mxu1 %v4275_v40  ;;  %v4391_v3 = vpop.eup %4390 }
 0x48f   : > { %v2470_v55 = vpop.f32.mrf.mxu0  ;;  %v2599_v20 = vpop.f32.mrf.mxu1 }
 0x490   : > { %3128 = vmatprep.mubr.bf16.mxu0 %v2627_v8  ;;  %v2620_v27 = vmul.f32 %v4383_v30, %v2599_v20  ;;  %v2615_v9 = vmul.f32 %v4387_v46, %v2470_v55 }
 0x491   : > { %4058 = vmatpush3.bf16.msra.mxu0 %v4276_v17  ;;  %4076 = vmatpush3.bf16.msra.mxu1 %v4277_v19  ;;  %v4194_v24 = vpop.f32.mrf.mxu0  ;;  %v4211_v60 = vpop.f32.mrf.mxu1 }
 0x492   : > { %4059 = vmatprep.subr.bf16.mxu0 %v4278_v21  ;;  %4077 = vmatprep.subr.bf16.mxu1 %v4279_v51  ;;  %v2626_v45 = vpack.c.bf16 %v2615_v9, %v2614_v2  ;;  %v4393_v22 = vpop.eup %4392  ;;  %v3182_v24 = vsub.s32 2, %v4596_v0  ;;  %v4300_v2 = vld [vmem:[%s4538_s23 + $0x34] ss:$8 sps:$4 sm:$0xff]  }
 0x493   : > { %v2555_v54 = vpop.f32.mrf.mxu0  ;;  %v2602_v58 = vpop.f32.mrf.mxu1 }
 0x494   : > { %v2621_v31 = vmul.f32 %v4385_v49, %v2602_v58  ;;  %v2618_v23 = vmul.f32 %v4393_v22, %v2555_v54  ;;  %v5019_v58 = vld [vmem:[%s4548_s14] sm:$0xff] }
 0x495   : > { %4060 = vmatpush3.bf16.msra.mxu0 %v4280_v12  ;;  %4078 = vmatpush3.bf16.msra.mxu1 %v4281_v28  ;;  %v4205_v7 = vpop.f32.mrf.mxu0  ;;  %v4212_v32 = vpop.f32.mrf.mxu1  ;;  %v3183_v26 = vrot.slane %v5019_v58, %v3182_v24  ;;  %v4307_v22 = vld [vmem:[%s4538_s23] ss:$8 sps:$4 sm:$0xff]   ;;  %v4311_v24 = vld [vmem:[%s4543_s28 + $0x38] sm:$0xff]  }
 0x496   : > { %v2629_v34 = vpack.c.bf16 %v2621_v31, %v2620_v27  ;;  %4061 = vmatprep.subr.bf16.mxu0 %v4282_v52  ;;  %4079 = vmatprep.subr.bf16.mxu1 %v4283_v57  ;;  %v4415_v7 = vld [vmem:[#allocation2] sm:$0xff] }
 0x497   : > { %v2558_v41 = vpop.f32.mrf.mxu0 }
 0x498   : > { %3169 = vmatprep.mubr.bf16.mxu1 %v2629_v34  ;;  %v2619_v4 = vmul.f32 %v4391_v3, %v2558_v41  ;;  %v4306_v3 = vld [vmem:[%s4538_s23 + $0x14] ss:$8 sps:$4 sm:$0xff]  }
 0x499   : > { %4062 = vmatpush3.bf16.msra.mxu0 %v4284_v25  ;;  %4080 = vmatpush3.bf16.msra.mxu1 %v4285_v33  ;;  %v4206_v16 = vpop.f32.mrf.mxu0 }
 0x49a   : > { %4063 = vmatprep.subr.bf16.mxu0 %v4286_v38  ;;  %4081 = vmatprep.subr.bf16.mxu1 %v4287_v36  ;;  %v2628_v10 = vpack.c.bf16 %v2619_v4, %v2618_v23  ;;  %v4416_v38 = vld [vmem:[#allocation2 + $0x8] sm:$0xff] }
 0x49b   : > { %v4309_v4 = vld [vmem:[%s4538_s23 + $0x4] ss:$8 sps:$4 sm:$0xff]  }
 0x49d   : > { %4064 = vmatpush3.bf16.msra.mxu0 %v4288_v48  ;;  %4082 = vmatpush3.bf16.msra.mxu1 %v4289_v50 }
 0x49e   : > { %4065 = vmatprep.subr.bf16.mxu0 %v4290_v43  ;;  %4083 = vmatprep.subr.bf16.mxu1 %v4291_v44 }
 0x4a1   : > { %4066 = vmatpush3.bf16.msra.mxu0 %v4292_v61  ;;  %4084 = vmatpush3.bf16.msra.mxu1 %v4293_v6 }
 0x4a2   : > { %4085 = vmatprep.subr.bf16.mxu1 %v4294_v62  ;;  %3287 = vmatprep.subr.bf16.mxu0 %v4300_v2 }
 0x4a4   : > { %3129 = vmatmul.mubr.bf16.vlgmr.msra.gmra.mxu0 %v2626_v45  ;;  %v4303_v45 = vld [vmem:[%s4538_s23 + $0x24] ss:$8 sps:$4 sm:$0xff]  }
 0x4a5   : > { %4086 = vmatpush3.bf16.msra.mxu1 %v4295_v37  ;;  %3311 = vmatprep.mubr.bf16.mxu0 %v4457_v56  ;;  %v4298_v37 = vld [vmem:[%s4538_s23 + $0x30] ss:$8 sps:$4 sm:$0xff]  }
 0x4a6   : > { %4087 = vmatprep.subr.bf16.mxu1 %v4296_v47  ;;  %3288 = vmatpush1.bf16.msra.mxu0 %v4298_v37  ;;  %v4301_v47 = vld [vmem:[%s4538_s23 + $0x20] ss:$8 sps:$4 sm:$0xff]  }
 0x4a7   : > { %3289 = vmatprep.subr.bf16.mxu0 %v4303_v45 }
 0x4a9   : > { %4088 = vmatpush3.bf16.msra.mxu1 %v4297_v11  ;;  %v4304_v11 = vld [vmem:[%s4538_s23 + $0x10] ss:$8 sps:$4 sm:$0xff]  }
 0x4aa   : > { %3290 = vmatpush1.bf16.msra.mxu0 %v4301_v47 }
 0x4ab   : > { %3291 = vmatprep.subr.bf16.mxu0 %v4306_v3 }
 0x4ac   : > { %3170 = vmatmul.mubr.bf16.vlgmr.msra.gmra.mxu1 %v2628_v10 }
 0x4ae   : > { %3292 = vmatpush1.bf16.msra.mxu0 %v4304_v11 }
 0x4af   : > { %3293 = vmatprep.subr.bf16.mxu0 %v4309_v4 }
 0x4b2   : > { %3294 = vmatpush1.bf16.msra.mxu0 %v4307_v22 }
 0x544   : > { %v4023_v14 = vpop.f32.mrf.mxu0 }
 0x546   : > { %v4024_v35 = vpop.f32.mrf.mxu0 }
 0x547   : > { %v4025_v56 = vadd.f32 %v4024_v35, %v4023_v14 }
 0x548   : > { %v4026_v40 = vpop.f32.mrf.mxu0 }
 0x54a   : > { %v4027_v18 = vpop.f32.mrf.mxu0 }
 0x54b   : > { %v4028_v12 = vadd.f32 %v4027_v18, %v4026_v40  ;;  %v3214_v18 = vsub.s32 3, %v4596_v0 }
 0x54c   : > { %v4045_v42 = vpop.f32.mrf.mxu1 }
 0x54e   : > { %v4046_v13 = vpop.f32.mrf.mxu1 }
 0x54f   : > { %v4047_v17 = vadd.f32 %v4046_v13, %v4045_v42 }
 0x550   : > { %v4048_v59 = vpop.f32.mrf.mxu1 }
 0x551   : > { %v3090_v55 = vadd.f32 %v4047_v17, %v4025_v56 }
 0x552   : > { %v4049_v19 = vpop.f32.mrf.mxu1 }
 0x553   : > { %v4050_v20 = vadd.f32 %v4049_v19, %v4048_v59  ;;  %v3215_v59 = vrot.slane %v5019_v58, %v3214_v18 }
 0x555   : > { %v3093_v49 = vadd.f32 %v4050_v20, %v4028_v12  ;;  %v4310_v20 = vld [vmem:[%s4543_s28 + $0x78] sm:$0xff]   ;;  %v4313_v12 = vld [vmem:[%s4543_s28 + $0x30] sm:$0xff]  }
 0x556   : > { %4095 = vmatprep.subr.bf16.mxu1 %v4310_v20 }
 0x557   : > { %4096 = vmatpush3.bf16.msra.mxu1 %v4311_v24 }
 0x564   : > { %v4067_v53 = vpop.f32.mrf.mxu0 }
 0x566   : > { %v4068_v29 = vpop.f32.mrf.mxu0 }
 0x567   : > { %v4069_v8 = vadd.f32 %v4068_v29, %v4067_v53  ;;  %v3220_v29 = vsub.s32 4, %v4596_v0 }
 0x568   : > { %v4070_v15 = vpop.f32.mrf.mxu0 }
 0x569   : > { %v3131_v28 = vadd.f32 %v4069_v8, %v3090_v55  ;;  %v3221_v56 = vrot.slane %v5019_v58, %v3220_v29 }
 0x56a   : > { %v4071_v21 = vpop.f32.mrf.mxu0 }
 0x56b   : > { %v4072_v30 = vadd.f32 %v4071_v21, %v4070_v15 }
 0x56c   : > { %v4089_v51 = vpop.f32.mrf.mxu1 }
 0x56d   : > { %v3134_v31 = vadd.f32 %v4072_v30, %v3093_v49  ;;  %v4315_v30 = vld [vmem:[%s4543_s28 + $0x28] sm:$0xff]   ;;  %v4318_v49 = vld [vmem:[%s4543_s28 + $0x58] sm:$0xff]  }
 0x56e   : > { %v4090_v60 = vpop.f32.mrf.mxu1 }
 0x56f   : > { %v4091_v52 = vadd.f32 %v4090_v60, %v4089_v51  ;;  %v4312_v60 = vld [vmem:[%s4543_s28 + $0x70] sm:$0xff]  }
 0x570   : > { %v4092_v57 = vpop.f32.mrf.mxu1  ;;  %4097 = vmatprep.subr.bf16.mxu1 %v4312_v60 }
 0x571   : > { %v3172_v54 = vadd.f32 %v4091_v52, %v3131_v28  ;;  %4098 = vmatpush3.bf16.msra.mxu1 %v4313_v12  ;;  %v4314_v28 = vld [vmem:[%s4543_s28 + $0x68] sm:$0xff]   ;;  %v4316_v52 = vld [vmem:[%s4543_s28 + $0x60] sm:$0xff]  }
 0x572   : > { %v4093_v27 = vpop.f32.mrf.mxu1  ;;  %4099 = vmatprep.subr.bf16.mxu1 %v4314_v28 }
 0x573   : > { %v3178_v32 = vadd.f32 %v4415_v7, %v3172_v54  ;;  %v4094_v25 = vadd.f32 %v4093_v27, %v4092_v57  ;;  %v4317_v57 = vld [vmem:[%s4543_s28 + $0x20] sm:$0xff]   ;;  %v4319_v54 = vld [vmem:[%s4543_s28 + $0x18] sm:$0xff]   ;;  %v4321_v27 = vld [vmem:[%s4543_s28 + $0x10] sm:$0xff]  }
 0x574   : > { %v4323_v7 = vld [vmem:[%s4543_s28 + $0x8] sm:$0xff]  }
 0x575   : > { %v3175_v33 = vadd.f32 %v4094_v25, %v3134_v31  ;;  %v5022_v34 = vadd.f32 %v3183_v26, %v3178_v32  ;;  %4100 = vmatpush3.bf16.msra.mxu1 %v4315_v30  ;;  %v4322_v31 = vld [vmem:[%s4543_s28 + $0x48] sm:$0xff]   ;;  %v4324_v32 = vld [vmem:[%s4543_s28 + $0x40] sm:$0xff]  }
 0x576   : > { %4101 = vmatprep.subr.bf16.mxu1 %v4316_v52  ;;  %v4325_v25 = vld [vmem:[%s4543_s28] sm:$0xff]  }
 0x577   : > { %v3179_v36 = vadd.f32 %v4416_v38, %v3175_v33  ;;  %v3186_v39 = vsel %vm691_vm1, %v5022_v34, 0.0  ;;  %v690_v33 = vld [vmem:[%s4553_s19] sm:$0x3] }
 0x578   : > { %3187 = vadd.xlane.f32.xlu0 %v3186_v39  ;;  %v3229_v38 = vrot.slane %v690_v33, %v721_v1 }
 0x579   : > { %v5026_v41 = vadd.f32 %v3183_v26, %v3179_v36  ;;  %4102 = vmatpush3.bf16.msra.mxu1 %v4317_v57  ;;  %v4320_v26 = vld [vmem:[%s4543_s28 + $0x50] sm:$0xff]   ;;  %v3233_v36 = vrot.slane %v690_v33, %v727_v5 }
 0x57a   : > { %4103 = vmatprep.subr.bf16.mxu1 %v4318_v49 }
 0x57b   : > { %v3189_v16 = vsel %vm691_vm1, %v5026_v41, 0.0 }
 0x57c   : > { %3190 = vadd.xlane.f32.xlu1 %v3189_v16 }
 0x57d   : > { %4104 = vmatpush3.bf16.msra.mxu1 %v4319_v54 }
 0x57e   : > { %4105 = vmatprep.subr.bf16.mxu1 %v4320_v26 }
 0x581   : > { %4106 = vmatpush3.bf16.msra.mxu1 %v4321_v27 }
 0x582   : > { %4107 = vmatprep.subr.bf16.mxu1 %v4322_v31 }
 0x585   : > { %4108 = vmatpush3.bf16.msra.mxu1 %v4323_v7 }
 0x586   : > { %4109 = vmatprep.subr.bf16.mxu1 %v4324_v32 }
 0x589   : > { %4110 = vmatpush3.bf16.msra.mxu1 %v4325_v25 }
 0x601   : > { %v3188_v48 = vpop.xlane.xlu0 %3187 }
 0x602   : > { %v3192_v50 = vmul.f32 0.015625, %v3188_v48 }
 0x604   : > { %v3194_v43 = vsub.f32 %v5022_v34, %v3192_v50 }
 0x605   : > { %v3191_v44 = vpop.xlane.xlu1 %3190 }
 0x606   : > { %v3193_v46 = vmul.f32 0.015625, %v3191_v44  ;;  %v3196_v61 = vmul.f32 %v3194_v43, %v3194_v43 }
 0x608   : > { %v3195_v6 = vsub.f32 %v5026_v41, %v3193_v46  ;;  %v3198_v9 = vsel %vm691_vm1, %v3196_v61, 0.0 }
 0x609   : > { %3199 = vadd.xlane.f32.xlu0 %v3198_v9 }
 0x60a   : > { %v3197_v62 = vmul.f32 %v3195_v6, %v3195_v6 }
 0x60c   : > { %v3201_v63 = vsel %vm691_vm1, %v3197_v62, 0.0 }
 0x60d   : > { %3202 = vadd.xlane.f32.xlu1 %v3201_v63 }
 0x692   : > { %v3200_v23 = vpop.xlane.xlu0 %3199 }
 0x693   : > { %v3204_v10 = vmul.f32 0.015625, %v3200_v23 }
 0x695   : > { %v3206_v14 = vadd.f32 1e-05, %v3204_v10 }
 0x696   : > { %v3203_v35 = vpop.xlane.xlu1 %3202 }
 0x697   : > { %4394 = vrsqrt.f32 %v3206_v14  ;;  %v3205_v40 = vmul.f32 0.015625, %v3203_v35 }
 0x699   : > { %v3207_v42 = vadd.f32 1e-05, %v3205_v40 }
 0x69b   : > { %4396 = vrsqrt.f32 %v3207_v42 }
 0x6a4   : > { %v4395_v13 = vpop.eup %4394 }
 0x6a5   : > { %v3210_v53 = vmul.f32 %v4395_v13, %v3194_v43 }
 0x6a7   : > { %v3216_v19 = vmul.f32 %v3215_v59, %v3210_v53 }
 0x6a8   : > { %v4397_v15 = vpop.eup %4396 }
 0x6a9   : > { %v3211_v17 = vmul.f32 %v4397_v15, %v3195_v6  ;;  %v3222_v21 = vadd.f32 %v3221_v56, %v3216_v19 }
 0x6ab   : > { %v3217_v8 = vmul.f32 %v3215_v59, %v3211_v17 }
 0x6ad   : > { %v3223_v51 = vadd.f32 %v3221_v56, %v3217_v8 }
 0x6af   : > { %v3224_v55 = vpack.c.bf16 %v3223_v51, %v3222_v21 }
 0x6b1   : > { %3939 = vmatmul.mubr.msk.bf16.vlgmr.msra.gmra.mxu0 %vm691_vm1, %v3224_v55 }
 0x771   : > { %v3313_v39 = vpop.f32.mrf.mxu0 }
 0x772   : > { %v5068_v16 = vadd.f32 %v3313_v39, %v3229_v38 }
 0x773   : > { %v3315_v48 = vpop.f32.mrf.mxu0 }
 0x774   : > { %v5071_v50 = vmul.f32 0.70710677, %v5068_v16  ;;  %v5073_v43 = vadd.f32 %v3315_v48, %v3233_v36 }
 0x775   : > { %v3317_v44 = vpop.f32.mrf.mxu0 }
 0x776   : > { %v3326_v46 = vand.u32 2147483647, %v5071_v50  ;;  %v5077_v61 = vmul.f32 0.70710677, %v5073_v43  ;;  %v5079_v6 = vadd.f32 %v3317_v44, %v3229_v38  ;;  %v3382_v14 = vsub.f32 0.0, %v5071_v50 }
 0x777   : > { %v3319_v1 = vpop.f32.mrf.mxu0  ;;  %vm3406_vm5 = vcmp.lt.f32.partialorder %v5071_v50, 0.0 }
 0x778   : > { %v3330_v9 = vmul.f32 0.3275911, %v3326_v46  ;;  %v3327_v5 = vand.u32 2147483647, %v5077_v61  ;;  %v5083_v62 = vmul.f32 0.70710677, %v5079_v6  ;;  %v5085_v63 = vadd.f32 %v3319_v1, %v3233_v36 }
 0x779   : > { %v3383_v35 = vsub.f32 0.0, %v5077_v61  ;;  %v3386_v40 = vmul.f32 %v3382_v14, %v5071_v50  ;;  %vm3407_vm4 = vcmp.lt.f32.partialorder %v5077_v61, 0.0 }
 0x77a   : > { %v3334_v2 = vadd.f32 1.0, %v3330_v9  ;;  %v3331_v37 = vmul.f32 0.3275911, %v3327_v5  ;;  %v3328_v45 = vand.u32 2147483647, %v5083_v62  ;;  %v3384_v42 = vsub.f32 0.0, %v5083_v62 }
 0x77b   : > { %v5089_v47 = vmul.f32 0.70710677, %v5085_v63  ;;  %v3387_v18 = vmul.f32 %v3383_v35, %v5077_v61  ;;  %v3390_v29 = vmul.f32 1.442695, %v3386_v40  ;;  %vm3408_vm6 = vcmp.lt.f32.partialorder %v5083_v62, 0.0 }
 0x77c   : > { %4398 = vrcp.f32 %v3334_v2  ;;  %v3335_v3 = vadd.f32 1.0, %v3331_v37  ;;  %v3332_v11 = vmul.f32 0.3275911, %v3328_v45  ;;  %v3388_v17 = vmul.f32 %v3384_v42, %v5083_v62 }
 0x77d   : > { %v3329_v4 = vand.u32 2147483647, %v5089_v47  ;;  %v3385_v53 = vsub.f32 0.0, %v5089_v47  ;;  %v3392_v8 = vmul.f32 1.442695, %v3387_v18  ;;  %vm3409_vm7 = vcmp.lt.f32.partialorder %v5089_v47, 0.0 }
 0x77e   : > { %4400 = vrcp.f32 %v3335_v3  ;;  %v3336_v22 = vadd.f32 1.0, %v3332_v11  ;;  %v3394_v60 = vmul.f32 1.442695, %v3388_v17  ;;  %v3419_v61 = vmul.f32 0.5, %v5073_v43 }
 0x77f   : > { %v3333_v23 = vmul.f32 0.3275911, %v3329_v4  ;;  %v3389_v21 = vmul.f32 %v3385_v53, %v5089_v47  ;;  %v3421_v50 = vmul.f32 0.5, %v5085_v63  ;;  %v3573_v47 = vsub.s32 5, %v4596_v0 }
 0x780   : > { %4402 = vrcp.f32 %v3336_v22 }
 0x781   : > { %v3337_v10 = vadd.f32 1.0, %v3333_v23  ;;  %v3396_v49 = vmul.f32 1.442695, %v3389_v21  ;;  %v3574_v43 = vrot.slane %v5019_v58, %v3573_v47 }
 0x783   : > { %4404 = vrcp.f32 %v3337_v10 }
 0x784   : > { %4406 = vpow2.f32 %v3390_v29 }
 0x785   : > { %4408 = vpow2.f32 %v3392_v8 }
 0x786   : > { %4410 = vpow2.f32 %v3394_v60 }
 0x787   : > { %4412 = vpow2.f32 %v3396_v49  ;;  %v3418_v49 = vmul.f32 0.5, %v5068_v16 }
 0x789   : > { %v4399_v13 = vpop.eup %4398 }
 0x78a   : > { %v3346_v59 = vmul.f32 1.0614054, %v4399_v13 }
 0x78b   : > { %v4401_v15 = vpop.eup %4400 }
 0x78c   : > { %v3940_v19 = vadd.f32 -1.4531521, %v3346_v59  ;;  %v3347_v56 = vmul.f32 1.0614054, %v4401_v15 }
 0x78d   : > { %v4403_v51 = vpop.eup %4402 }
 0x78e   : > { %v3354_v55 = vmul.f32 %v4399_v13, %v3940_v19  ;;  %v3941_v20 = vadd.f32 -1.4531521, %v3347_v56  ;;  %v3348_v24 = vmul.f32 1.0614054, %v4403_v51 }
 0x790   : > { %v4405_v12 = vpop.eup %4404  ;;  %v3358_v28 = vadd.f32 1.4214138, %v3354_v55  ;;  %v3355_v30 = vmul.f32 %v4401_v15, %v3941_v20  ;;  %v3942_v52 = vadd.f32 -1.4531521, %v3348_v24 }
 0x791   : > { %v3349_v57 = vmul.f32 1.0614054, %v4405_v12  ;;  %v4407_v37 = vpop.eup %4406 }
 0x792   : > { %v3362_v54 = vmul.f32 %v4399_v13, %v3358_v28  ;;  %v3359_v26 = vadd.f32 1.4214138, %v3355_v30  ;;  %v3356_v27 = vmul.f32 %v4403_v51, %v3942_v52  ;;  %v4409_v22 = vpop.eup %4408  ;;  %v3420_v30 = vmul.f32 0.5, %v5079_v6 }
 0x793   : > { %v3943_v31 = vadd.f32 -1.4531521, %v3349_v57  ;;  %v4411_v18 = vpop.eup %4410 }
 0x794   : > { %v3944_v7 = vadd.f32 -0.28449672, %v3362_v54  ;;  %v3363_v32 = vmul.f32 %v4401_v15, %v3359_v26  ;;  %v3360_v25 = vadd.f32 1.4214138, %v3356_v27  ;;  %v4413_v17 = vpop.eup %4412 }
 0x795   : > { %v3357_v33 = vmul.f32 %v4405_v12, %v3943_v31 }
 0x796   : > { %v3370_v38 = vmul.f32 %v4399_v13, %v3944_v7  ;;  %v3945_v36 = vadd.f32 -0.28449672, %v3363_v32  ;;  %v3364_v39 = vmul.f32 %v4403_v51, %v3360_v25 }
 0x797   : > { %v3361_v48 = vadd.f32 1.4214138, %v3357_v33 }
 0x798   : > { %v3374_v44 = vadd.f32 0.2548296, %v3370_v38  ;;  %v3371_v46 = vmul.f32 %v4401_v15, %v3945_v36  ;;  %v3946_v1 = vadd.f32 -0.28449672, %v3364_v39 }
 0x799   : > { %v3365_v9 = vmul.f32 %v4405_v12, %v3361_v48 }
 0x79a   : > { %v3378_v5 = vmul.f32 %v4399_v13, %v3374_v44  ;;  %v3375_v2 = vadd.f32 0.2548296, %v3371_v46  ;;  %v3372_v45 = vmul.f32 %v4403_v51, %v3946_v1 }
 0x79b   : > { %v3947_v3 = vadd.f32 -0.28449672, %v3365_v9 }
 0x79c   : > { %v3398_v11 = vmul.f32 %v4407_v37, %v3378_v5  ;;  %v3379_v4 = vmul.f32 %v4401_v15, %v3375_v2  ;;  %v3376_v23 = vadd.f32 0.2548296, %v3372_v45 }
 0x79d   : > { %v3373_v10 = vmul.f32 %v4405_v12, %v3947_v3 }
 0x79e   : > { %v3402_v14 = vsub.f32 1.0, %v3398_v11  ;;  %v3399_v35 = vmul.f32 %v4409_v22, %v3379_v4  ;;  %v3380_v40 = vmul.f32 %v4403_v51, %v3376_v23 }
 0x79f   : > { %v3377_v42 = vadd.f32 0.2548296, %v3373_v10 }
 0x7a0   : > { %v3403_v53 = vsub.f32 1.0, %v3399_v35  ;;  %v3400_v59 = vmul.f32 %v4411_v18, %v3380_v40  ;;  %v3410_v19 = vsub.f32 0.0, %v3402_v14 }
 0x7a1   : > { %v3381_v29 = vmul.f32 %v4405_v12, %v3377_v42 }
 0x7a2   : > { %v3411_v13 = vsub.f32 0.0, %v3403_v53  ;;  %v3404_v56 = vsub.f32 1.0, %v3400_v59  ;;  %v3414_v20 = vsel %vm3406_vm5, %v3410_v19, %v3402_v14 }
 0x7a3   : > { %v3401_v8 = vmul.f32 %v4413_v17, %v3381_v29  ;;  %v3422_v12 = vadd.f32 1.0, %v3414_v20 }
 0x7a4   : > { %v3415_v15 = vsel %vm3407_vm4, %v3411_v13, %v3403_v53  ;;  %v3412_v21 = vsub.f32 0.0, %v3404_v56 }
 0x7a5   : > { %v3405_v55 = vsub.f32 1.0, %v3401_v8  ;;  %v3423_v60 = vadd.f32 1.0, %v3415_v15  ;;  %v3426_v27 = vmul.f32 %v3422_v12, %v3418_v49 }
 0x7a6   : > { %v3416_v51 = vsel %vm3408_vm6, %v3412_v21, %v3404_v56 }
 0x7a7   : > { %v3413_v24 = vsub.f32 0.0, %v3405_v55  ;;  %v3424_v28 = vadd.f32 1.0, %v3416_v51  ;;  %v3427_v26 = vmul.f32 %v3423_v60, %v3419_v61 }
 0x7a9   : > { %v3417_v52 = vsel %vm3409_vm7, %v3413_v24, %v3405_v55  ;;  %v3428_v54 = vmul.f32 %v3424_v28, %v3420_v30 }
 0x7aa   : > { %v3425_v57 = vadd.f32 1.0, %v3417_v52 }
 0x7ab   : > { %v3430_v7 = vpack.c.bf16 %v3428_v54, %v3426_v27 }
 0x7ac   : > { %v3429_v62 = vmul.f32 %v3425_v57, %v3421_v50 }
 0x7ae   : > { %v3431_v31 = vpack.c.bf16 %v3429_v62, %v3427_v26 }
 0x7b0   : > { %3560 = vmatprep.mubr.bf16.mxu1 %v3431_v31 }
 0x7b1   : > { %3561 = vmatmul.mubr.bf16.vlgmr.msra.gmra.mxu1 %v3430_v7 }
 0x871   : > { %v4111_v32 = vpop.f32.mrf.mxu1 }
 0x873   : > { %v4112_v6 = vpop.f32.mrf.mxu1 }
 0x874   : > { %v4113_v25 = vadd.f32 %v4112_v6, %v4111_v32 }
 0x875   : > { %v4114_v33 = vpop.f32.mrf.mxu1 }
 0x876   : > { %v3569_v63 = vadd.f32 %v4113_v25, %v5022_v34 }
 0x877   : > { %v4115_v38 = vpop.f32.mrf.mxu1 }
 0x878   : > { %v3575_v16 = vadd.f32 %v3574_v43, %v3569_v63  ;;  %v4116_v36 = vadd.f32 %v4115_v38, %v4114_v33  ;;  %3580 = sbr.rel (%p3964_p5) target bundleno = 2175 (0x87f), region = 64 }
 0x87a   : > { %v3570_v39 = vadd.f32 %v4116_v36, %v5026_v41 }
 0x87c   : > { %v3576_v48 = vadd.f32 %v3574_v43, %v3570_v39 }
 0x87d   : > { %3581 = vst.msk [vmem:[#allocation2] sm:$0xff] %vm691_vm1, %v3575_v16 }
 0x87e   : > { %3582 = vst.msk [vmem:[#allocation2 + $0x8] sm:$0xff] %vm691_vm1, %v3576_v48 }
 0x87f PF: > { %p3965_p6 = scmp.ne.s32.totalorder %s4519_s10, 1 }
 0x881   : > { %3586 = sbr.rel (%p3965_p6) target bundleno = 2495 (0x9bf), region = 68 }
 0x886   : > { %v3589_v0 = vsel %vm691_vm1, %v3575_v16, 0.0  ;;  %v3592_v58 = vsel %vm691_vm1, %v3576_v48, 0.0  ;;  %v3966_v35 = vld [vmem:[%s5152_s8] ss:$0 sm:$0xff]  ;;  %v3967_v42 = vld [vmem:[%s5152_s8 + $0x1] ss:$0 sm:$0xff] }
 0x887   : > { %3590 = vadd.xlane.f32.xlu0 %v3589_v0 }
 0x88b   : > { %3593 = vadd.xlane.f32.xlu0 %v3592_v58 }
 0x910   : > { %v3591_v34 = vpop.xlane.xlu0 %3590 }
 0x911   : > { %v3595_v41 = vmul.f32 0.015625, %v3591_v34 }
 0x913   : > { %v3597_v44 = vsub.f32 %v3575_v16, %v3595_v41 }
 0x914   : > { %v3594_v46 = vpop.xlane.xlu0 %3593 }
 0x915   : > { %v3596_v1 = vmul.f32 0.015625, %v3594_v46  ;;  %v3599_v9 = vmul.f32 %v3597_v44, %v3597_v44 }
 0x917   : > { %v3598_v5 = vsub.f32 %v3576_v48, %v3596_v1  ;;  %v3601_v2 = vsel %vm691_vm1, %v3599_v9, 0.0 }
 0x918   : > { %3602 = vadd.xlane.f32.xlu1 %v3601_v2 }
 0x919   : > { %v3600_v37 = vmul.f32 %v3598_v5, %v3598_v5 }
 0x91b   : > { %v3604_v45 = vsel %vm691_vm1, %v3600_v37, 0.0 }
 0x91c   : > { %3605 = vadd.xlane.f32.xlu1 %v3604_v45 }
 0x9a1   : > { %v3603_v3 = vpop.xlane.xlu1 %3602 }
 0x9a2   : > { %v3607_v11 = vmul.f32 0.015625, %v3603_v3 }
 0x9a4   : > { %v3609_v4 = vadd.f32 1e-05, %v3607_v11 }
 0x9a5   : > { %v3606_v22 = vpop.xlane.xlu1 %3605 }
 0x9a6   : > { %4417 = vrsqrt.f32 %v3609_v4  ;;  %v3608_v23 = vmul.f32 0.015625, %v3606_v22 }
 0x9a8   : > { %v3610_v10 = vadd.f32 1e-05, %v3608_v23 }
 0x9aa   : > { %4419 = vrsqrt.f32 %v3610_v10 }
 0x9b3   : > { %v4418_v14 = vpop.eup %4417 }
 0x9b4   : > { %v3613_v40 = vmul.f32 %v4418_v14, %v3597_v44 }
 0x9b6   : > { %v3619_v18 = vmul.f32 %v3966_v35, %v3613_v40 }
 0x9b7   : > { %v4420_v53 = vpop.eup %4419 }
 0x9b8   : > { %v3625_v59 = vadd.f32 %v3967_v42, %v3619_v18  ;;  %v3614_v29 = vmul.f32 %v4420_v53, %v3598_v5 }
 0x9ba   : > { %3627 = vst.msk [vmem:[#allocation2] sm:$0xff] %vm691_vm1, %v3625_v59  ;;  %v3620_v17 = vmul.f32 %v3966_v35, %v3614_v29 }
 0x9bc   : > { %v3626_v19 = vadd.f32 %v3967_v42, %v3620_v17 }
 0x9be   : > { %3628 = vst.msk [vmem:[#allocation2 + $0x8] sm:$0xff] %vm691_vm1, %v3626_v19 }
 0x9bf PF: > { %s4460_s29 = smov [#allocation2]  }
 0x9c0   : > { %s3635_s13 = sshll.u32 %s4460_s29, 4  ;;  %s3636_s13 = int_to_ptr.vmem [resolvable:$true] %s3635_s13 }
 0x9c1   : > { %s4421_s14 = scalar_lea.vmem %s3636_s13, 256  ;;  %p4428_p10 = scmp.lt.s32.totalorder %s3636_s13, %s3636_s13 }
 0x9c2   : > { %p4422_p7 = scmp.ne.s32.totalorder %s3636_s13, %s4421_s14  ;;  %p4429_p11 = scmp.lt.s32.totalorder %s4421_s14, %s4421_s14 }
 0x9c4   : > { %p4423_p8 = pnand %p4422_p7, %p3964_p5  ;;  %p4430_p12 = por %p4429_p11, %p4428_p10 }
 0x9c6   : > { %p4424_p9 = pneg %p4423_p8 }
 0x9c8   : > { %p4431_p13 = pnand %p4430_p12, %p4424_p9 }
 0x9ca   : > { %4434 = shalt.err (!%p4431_p13)
}
 0x9cb   : > { %s4461_s15 = smov 128   ;;  %s4462_s12 = smov 8  }
 0x9cc   : > { %4215 = dma.vmem_to_hbm [thread:$0]  (%p3964_p5), %s3636_s13, 256, %s5153_s9, [#allocation3], %s4461_s15, %s4461_s15, %s4462_s12  }
 0x9cd   : > { %4450 = dma.done.wait (%p3964_p5), [#allocation3], 256  }
 0x9ce   : > { %4452 = vsyncadd (%p3964_p5), [#allocation3], 4294967040 }
 0x9cf PF: > { %s20_s30 = sadd.s32 1, %s4455_s30  }
 0x9d0   : > { %p17_p0 = scmp.ge.s32.totalorder %s20_s30, 4  }
 0x9d2   :  { %19 = sbr.rel (!%p17_p0) target bundleno = 1 (0x1), region = 110 }
 0x9d7   :  { %3651 = vsyncpa [#allocation3], 1 }
 0x9d8   :  { %3653 = vsyncpa [#allocation3 + $0x1], 1 }

</bundles_post_ra>
